<compile_context>
chip_gen: v7x
topology: tpu7x:2x2x1
jax: 0.10.0
libtpu: 0.0.40
codegen_flags: <defaults>
</compile_context>

<pallas_src>
import functools
import math

import jax
import jax.numpy as jnp
from jax.experimental import pallas as pl
from jax.experimental.pallas import tpu as pltpu


# ----------------------------------------------------------------------------
# RoPE tables in "[even | odd] half" layout (see weight permutation below).
# ----------------------------------------------------------------------------
def _rope_tables(seq_len, head_dim, st_pos, base=10000.0):
    theta = 1.0 / (base ** (jnp.arange(0, head_dim, 2, dtype=jnp.float32) / head_dim))
    pos = jnp.arange(st_pos, st_pos + seq_len, dtype=jnp.float32)[:, None]
    ang = pos * theta[None, :]                              # (S, hd/2)
    cos = jnp.cos(ang)
    sin = jnp.sin(ang)
    cos_cat = jnp.concatenate([cos, cos], axis=-1)          # (S, hd)
    sin_rot = jnp.concatenate([-sin, sin], axis=-1)         # (S, hd)
    return cos_cat, sin_rot


# ----------------------------------------------------------------------------
# Fused per-(head, batch) kernel: QKV projection + RoPE + softmax attention.
# Q/K weights are pre-permuted so each head's features come out as [even | odd]
# halves; RoPE then becomes a lane-friendly rotate-half (XLU roll) instead of a
# stride-2 interleave.  Scores are permutation-invariant, so attention is exact.
# ----------------------------------------------------------------------------
def _attention_head_kernel(x_ref, wq_ref, wk_ref, wv_ref, cos_ref, sin_ref, mask_ref,
                           ctx_ref, krot_ref, v_ref, *, head_dim):
    scale = 1.0 / math.sqrt(head_dim)

    x = x_ref[...]                                                     # (S, D) bf16
    # Per-head projections: bf16 in, f32 accumulate (MXU native).
    q = jnp.dot(x, wq_ref[...], preferred_element_type=jnp.float32)   # (S, hd)
    k = jnp.dot(x, wk_ref[...], preferred_element_type=jnp.float32)   # (S, hd)
    v = jnp.dot(x, wv_ref[...], preferred_element_type=jnp.float32)   # (S, hd)

    # RoPE in half layout: rot(t) = t * cos + roll(t, hd/2) * [-sin | sin]
    cos = cos_ref[...]
    sin = sin_ref[...]
    q = q * cos + pltpu.roll(q, shift=head_dim // 2, axis=1) * sin
    k = k * cos + pltpu.roll(k, shift=head_dim // 2, axis=1) * sin

    # Scaled dot-product attention, softmax in f32.
    s = jax.lax.dot_general(q.astype(jnp.bfloat16), k.astype(jnp.bfloat16),
                            (((1,), (1,)), ((), ())),
                            preferred_element_type=jnp.float32)        # (S, S)
    s = s * scale + mask_ref[...]
    m = jnp.max(s, axis=-1, keepdims=True)
    p = jnp.exp(s - m)
    denom = jnp.sum(p, axis=-1, keepdims=True)
    ctx = jnp.dot(p.astype(jnp.bfloat16), v.astype(jnp.bfloat16),
                  preferred_element_type=jnp.float32) / denom          # (S, hd)

    ctx_ref[...] = ctx
    krot_ref[...] = k        # RoPE'd keys, half layout (re-interleaved in the wrapper)
    v_ref[...] = v


def _attention_heads(x_bf, wq_t, wk_t, wv_t, cos_cat, sin_rot, mask, *, num_heads, head_dim):
    B, S, D = x_bf.shape
    kern = functools.partial(_attention_head_kernel, head_dim=head_dim)
    head_out_spec = pl.BlockSpec((None, None, S, head_dim), lambda h, b: (b, h, 0, 0))
    out_shape = (
        jax.ShapeDtypeStruct((B, num_heads, S, head_dim), jnp.float32),  # attention context
        jax.ShapeDtypeStruct((B, num_heads, S, head_dim), jnp.float32),  # rope'd K (half layout)
        jax.ShapeDtypeStruct((B, num_heads, S, head_dim), jnp.float32),  # V
    )
    return pl.pallas_call(
        kern,
        out_shape=out_shape,
        grid_spec=pltpu.PrefetchScalarGridSpec(
            num_scalar_prefetch=0,
            # heads on the outer axis: the per-head weight tiles keep the same block
            # index across the inner batch loop and stay resident in VMEM.
            grid=(num_heads, B),
            in_specs=[
                pl.BlockSpec((None, S, D), lambda h, b: (b, 0, 0)),          # x rows (this batch)
                pl.BlockSpec((D, head_dim), lambda h, b: (0, h)),            # Wq^T head slice
                pl.BlockSpec((D, head_dim), lambda h, b: (0, h)),            # Wk^T head slice
                pl.BlockSpec((D, head_dim), lambda h, b: (0, h)),            # Wv^T head slice
                pl.BlockSpec((S, head_dim), lambda h, b: (0, 0)),            # cos table
                pl.BlockSpec((S, head_dim), lambda h, b: (0, 0)),            # sin table
                pl.BlockSpec((S, S), lambda h, b: (0, 0)),                   # additive mask
            ],
            out_specs=[head_out_spec, head_out_spec, head_out_spec],
        ),
        compiler_params=pltpu.CompilerParams(
            dimension_semantics=("parallel", "parallel"),
            vmem_limit_bytes=32 * 1024 * 1024,
        ),
    )(x_bf, wq_t, wk_t, wv_t, cos_cat, sin_rot, mask)


# ----------------------------------------------------------------------------
# Output projection: A @ Wo^T  (Wo fully VMEM-resident, rows tiled, no scratch).
# ----------------------------------------------------------------------------
def _out_proj_kernel(a_ref, w_ref, o_ref):
    o_ref[...] = jnp.dot(a_ref[...], w_ref[...],
                         preferred_element_type=jnp.float32).astype(o_ref.dtype)


def _out_proj(a2d_bf, wo_t_bf, *, tm=128):
    M, Din = a2d_bf.shape
    Dout = wo_t_bf.shape[1]
    Mp = pl.cdiv(M, tm) * tm
    if Mp != M:                                   # guard non-divisible row counts
        a2d_bf = jnp.pad(a2d_bf, ((0, Mp - M), (0, 0)))
    out = pl.pallas_call(
        _out_proj_kernel,
        out_shape=jax.ShapeDtypeStruct((Mp, Dout), jnp.float32),
        grid_spec=pltpu.PrefetchScalarGridSpec(
            num_scalar_prefetch=0,
            grid=(Mp // tm,),
            in_specs=[
                pl.BlockSpec((tm, Din), lambda i: (i, 0)),
                pl.BlockSpec((Din, Dout), lambda i: (0, 0)),   # Wo stays resident
            ],
            out_specs=pl.BlockSpec((tm, Dout), lambda i: (i, 0)),
        ),
        compiler_params=pltpu.CompilerParams(
            dimension_semantics=("parallel",),
            vmem_limit_bytes=32 * 1024 * 1024,
        ),
    )(a2d_bf, wo_t_bf)
    return out[:M]


# ----------------------------------------------------------------------------
# Full forward, mirroring SelfAttention.forward.
# ----------------------------------------------------------------------------
@functools.partial(jax.jit, static_argnames=("num_heads", "st_pos"))
def self_attention_forward(x, wq, wk, wv, wo, cache_k, cache_v, *,
                           num_heads, st_pos=0, mask=None):
    """Weights are in PyTorch nn.Linear layout (out_features, in_features).

    Returns (output, attn_ctx, new_cache_k, new_cache_v).  `output` matches the
    reference exactly (Wo applied to the transposed/reshaped input, see header note);
    `attn_ctx` is the per-head attention context the reference computes then discards.
    """
    x = x.astype(jnp.float32)
    B, S, D = x.shape
    H = num_heads
    assert D % H == 0
    hd = D // H
    assert hd % 128 == 0 and D % 128 == 0 and S % 8 == 0, "TPU-friendly shapes expected"
    # TODO(synk): decode path (st_pos > 0: attention over previously cached keys/values)
    # is not implemented in-kernel; only the prefill path (st_pos == 0) is supported.
    assert st_pos == 0

    # ---- wrapper-side layout plumbing (no compute hoisted) ----
    # (in, out) weight layout for x @ W on the MXU; Q/K output features reordered into
    # [even | odd] halves per head so in-kernel RoPE is a rotate-half; bf16 for the MXU.
    perm_head = jnp.concatenate([jnp.arange(0, hd, 2), jnp.arange(1, hd, 2)])
    perm = (jnp.arange(H)[:, None] * hd + perm_head[None, :]).reshape(-1)
    wq_t = wq.T[:, perm].astype(jnp.bfloat16)
    wk_t = wk.T[:, perm].astype(jnp.bfloat16)
    wv_t = wv.T.astype(jnp.bfloat16)
    wo_t = wo.T.astype(jnp.bfloat16)
    x_bf = x.astype(jnp.bfloat16)

    cos_cat, sin_rot = _rope_tables(S, hd, st_pos)
    if mask is None:
        mask_f = jnp.zeros((S, S), jnp.float32)
    else:
        mask_f = jnp.broadcast_to(mask.astype(jnp.float32), (S, S))

    ctx, k_half, v_heads = _attention_heads(
        x_bf, wq_t, wk_t, wv_t, cos_cat, sin_rot, mask_f, num_heads=H, head_dim=hd)

    # Undo the half-layout permutation on the RoPE'd keys and update both caches at
    # st_pos in the module's (B, S, H, hd) layout (the reference's side effect).
    k_bshd = jnp.transpose(k_half, (0, 2, 1, 3))
    k_int = jnp.stack([k_bshd[..., :hd // 2], k_bshd[..., hd // 2:]],
                      axis=-1).reshape(B, S, H, hd)
    v_bshd = jnp.transpose(v_heads, (0, 2, 1, 3))
    new_cache_k = jax.lax.dynamic_update_slice(cache_k, k_int, (0, st_pos, 0, 0))
    new_cache_v = jax.lax.dynamic_update_slice(cache_v, v_bshd, (0, st_pos, 0, 0))

    # Reference quirk reproduced exactly: A is overwritten with a transposed/reshaped
    # copy of the *input* right before the Wo projection.
    a = jnp.transpose(x, (0, 2, 1)).reshape(B, S, D)
    out2d = _out_proj(a.reshape(B * S, D).astype(jnp.bfloat16), wo_t)
    output = out2d.reshape(B, S, D)

    return output, ctx, new_cache_k, new_cache_v


# ----------------------------------------------------------------------------
# Pure-JAX reference, mirroring the PyTorch module line by line.
# ----------------------------------------------------------------------------
def self_attention_ref(x, wq, wk, wv, wo, cache_k, cache_v, *,
                       num_heads, st_pos=0, mask=None, base=10000.0):
    x = x.astype(jnp.float32)
    B, S, D = x.shape
    H = num_heads
    hd = D // H

    xq = (x @ wq.T).reshape(B, S, H, hd)
    xk = (x @ wk.T).reshape(B, S, H, hd)
    xv = (x @ wv.T).reshape(B, S, H, hd)

    theta = 1.0 / (base ** (jnp.arange(0, hd, 2, dtype=jnp.float32) / hd))
    ang = jnp.arange(st_pos, st_pos + S, dtype=jnp.float32)[:, None] * theta[None, :]
    sin = jnp.sin(ang)[None, :, None, :]
    cos = jnp.cos(ang)[None, :, None, :]

    def rope(t):
        te, to = t[..., 0::2], t[..., 1::2]
        re = te * cos - to * sin
        ro = te * sin + to * cos
        return jnp.stack([re, ro], axis=-1).reshape(t.shape)

    xq = rope(xq)
    xk = rope(xk)

    cache_k = jax.lax.dynamic_update_slice(cache_k, xk, (0, st_pos, 0, 0))
    cache_v = jax.lax.dynamic_update_slice(cache_v, xv, (0, st_pos, 0, 0))
    keys = cache_k[:B, :st_pos + S]
    values = cache_v[:B, :st_pos + S]
    # n_rep == 1 in the reference module (n_kv_heads is set to num_heads): repeat_kv is identity.

    q = jnp.transpose(xq, (0, 2, 1, 3))
    k = jnp.transpose(keys, (0, 2, 1, 3))
    v = jnp.transpose(values, (0, 2, 1, 3))
    y = jnp.einsum("bhqd,bhkd->bhqk", q, k) / math.sqrt(hd)
    if mask is not None:
        y = y + mask
    y = jax.nn.softmax(y, axis=-1)
    attn_ctx = jnp.einsum("bhqk,bhkd->bhqd", y, v)     # computed, then discarded by the reference

    a = jnp.transpose(x, (0, 2, 1)).reshape(B, S, D)   # the reference's overwrite of A
    output = a @ wo.T
    return output, attn_ctx, cache_k, cache_v


if __name__ == "__main__":
    # Small shapes consistent with a scaled-down ModelArgs.
    batch, seq_len, d_model, num_heads = 2, 128, 256, 2
    head_dim = d_model // num_heads          # 128
    max_seq_len = 256                         # cache capacity (args.seq_len)
    st_pos = 0

    key = jax.random.PRNGKey(0)
    kx, kq, kk, kv, ko = jax.random.split(key, 5)
    x = jax.random.normal(kx, (batch, seq_len, d_model), jnp.float32)

    def init_linear(k, out_f, in_f):          # nn.Linear layout (out, in), Kaiming-uniform-like
        bound = 1.0 / (in_f ** 0.5)
        return jax.random.uniform(k, (out_f, in_f), jnp.float32, -bound, bound)

    wq = init_linear(kq, num_heads * head_dim, d_model)
    wk = init_linear(kk, num_heads * head_dim, d_model)
    wv = init_linear(kv, num_heads * head_dim, d_model)
    wo = init_linear(ko, d_model, num_heads * head_dim)

    cache_k = jnp.zeros((batch, max_seq_len, num_heads, head_dim), jnp.float32)
    cache_v = jnp.zeros((batch, max_seq_len, num_heads, head_dim), jnp.float32)

    causal = jnp.tril(jnp.ones((seq_len, seq_len), dtype=bool))
    mask = jnp.where(causal, 0.0, -1e30).astype(jnp.float32)

    out, ctx, new_ck, new_cv = self_attention_forward(
        x, wq, wk, wv, wo, cache_k, cache_v,
        num_heads=num_heads, st_pos=st_pos, mask=mask)
    out, ctx, new_ck, new_cv = jax.block_until_ready((out, ctx, new_ck, new_cv))

    ref_out, ref_ctx, ref_ck, ref_cv = self_attention_ref(
        x, wq, wk, wv, wo, cache_k, cache_v,
        num_heads=num_heads, st_pos=st_pos, mask=mask)

    checks = [
        ("output", out, ref_out, 2e-2),
        ("attn_ctx", ctx, ref_ctx, 5e-2),
        ("cache_k", new_ck, ref_ck, 2e-2),
        ("cache_v", new_cv, ref_cv, 2e-2),
    ]
    for name, got, ref, tol in checks:
        assert got.shape == ref.shape, f"{name} shape mismatch"
        assert jnp.allclose(got, ref, atol=tol, rtol=tol), f"{name} mismatch vs reference"

    print("KERNEL_OK")
</pallas_src>

<mosaic_0001>
module attributes {stable_mosaic.version = 11 : i64} {
  func.func @_attention_head_kernel(%arg0: i32, %arg1: i32, %arg2: memref<1x128x256xbf16, #tpu.memory_space<vmem>>, %arg3: memref<256x128xbf16, #tpu.memory_space<vmem>>, %arg4: memref<256x128xbf16, #tpu.memory_space<vmem>>, %arg5: memref<256x128xbf16, #tpu.memory_space<vmem>>, %arg6: memref<128x128xf32, #tpu.memory_space<vmem>>, %arg7: memref<128x128xf32, #tpu.memory_space<vmem>>, %arg8: memref<128x128xf32, #tpu.memory_space<vmem>>, %arg9: memref<1x1x128x128xf32, #tpu.memory_space<vmem>>, %arg10: memref<1x1x128x128xf32, #tpu.memory_space<vmem>>, %arg11: memref<1x1x128x128xf32, #tpu.memory_space<vmem>>) attributes {dimension_semantics = [#tpu.dimension_semantics<parallel>, #tpu.dimension_semantics<parallel>], iteration_bounds = array<i64: 2, 2>, scalar_prefetch = 0 : i64, scratch_operands = 0 : i64, tpu.core_type = #tpu.core_type<tc>, window_params = [{transform_indices = @transform_0, window_bounds = array<i64: 1, 128, 256>}, {transform_indices = @transform_1, window_bounds = array<i64: 256, 128>}, {transform_indices = @transform_2, window_bounds = array<i64: 256, 128>}, {transform_indices = @transform_3, window_bounds = array<i64: 256, 128>}, {pipeline_mode = #tpu.pipeline_mode<synchronous>, transform_indices = @transform_4, window_bounds = array<i64: 128, 128>}, {pipeline_mode = #tpu.pipeline_mode<synchronous>, transform_indices = @transform_5, window_bounds = array<i64: 128, 128>}, {pipeline_mode = #tpu.pipeline_mode<synchronous>, transform_indices = @transform_6, window_bounds = array<i64: 128, 128>}, {transform_indices = @transform_7, window_bounds = array<i64: 1, 1, 128, 128>}, {transform_indices = @transform_8, window_bounds = array<i64: 1, 1, 128, 128>}, {transform_indices = @transform_9, window_bounds = array<i64: 1, 1, 128, 128>}]} {
    %c0 = arith.constant 0 : index
    %c0_0 = arith.constant 0 : index
    %c0_1 = arith.constant 0 : index
    %0 = vector.load %arg2[%c0, %c0_0, %c0_1] : memref<1x128x256xbf16, #tpu.memory_space<vmem>>, vector<1x128x256xbf16>
    %1 = vector.shape_cast %0 : vector<1x128x256xbf16> to vector<128x256xbf16>
    %c0_2 = arith.constant 0 : index
    %c0_3 = arith.constant 0 : index
    %2 = vector.load %arg3[%c0_2, %c0_3] : memref<256x128xbf16, #tpu.memory_space<vmem>>, vector<256x128xbf16>
    %cst = arith.constant dense<0.000000e+00> : vector<128x128xf32>
    %3 = tpu.matmul %1, %2, %cst {dimension_numbers = #tpu.dot_dimension_numbers<[1], [0], [0], [1], [0, 0, 1, 1], [], []>} : vector<128x256xbf16>, vector<256x128xbf16>, vector<128x128xf32> -> vector<128x128xf32>
    %c0_4 = arith.constant 0 : index
    %c0_5 = arith.constant 0 : index
    %4 = vector.load %arg4[%c0_4, %c0_5] : memref<256x128xbf16, #tpu.memory_space<vmem>>, vector<256x128xbf16>
    %cst_6 = arith.constant dense<0.000000e+00> : vector<128x128xf32>
    %5 = tpu.matmul %1, %4, %cst_6 {dimension_numbers = #tpu.dot_dimension_numbers<[1], [0], [0], [1], [0, 0, 1, 1], [], []>} : vector<128x256xbf16>, vector<256x128xbf16>, vector<128x128xf32> -> vector<128x128xf32>
    %c0_7 = arith.constant 0 : index
    %c0_8 = arith.constant 0 : index
    %6 = vector.load %arg5[%c0_7, %c0_8] : memref<256x128xbf16, #tpu.memory_space<vmem>>, vector<256x128xbf16>
    %cst_9 = arith.constant dense<0.000000e+00> : vector<128x128xf32>
    %7 = tpu.matmul %1, %6, %cst_9 {dimension_numbers = #tpu.dot_dimension_numbers<[1], [0], [0], [1], [0, 0, 1, 1], [], []>} : vector<128x256xbf16>, vector<256x128xbf16>, vector<128x128xf32> -> vector<128x128xf32>
    %c0_10 = arith.constant 0 : index
    %c0_11 = arith.constant 0 : index
    %8 = vector.load %arg6[%c0_10, %c0_11] : memref<128x128xf32, #tpu.memory_space<vmem>>, vector<128x128xf32>
    %c0_12 = arith.constant 0 : index
    %c0_13 = arith.constant 0 : index
    %9 = vector.load %arg7[%c0_12, %c0_13] : memref<128x128xf32, #tpu.memory_space<vmem>>, vector<128x128xf32>
    %10 = arith.mulf %3, %8 : vector<128x128xf32>
    %c64_i32 = arith.constant 64 : i32
    %11 = tpu.dynamic_rotate %3 by %c64_i32 dim 1 : vector<128x128xf32>, i32 -> vector<128x128xf32>
    %12 = arith.mulf %11, %9 : vector<128x128xf32>
    %13 = arith.addf %10, %12 : vector<128x128xf32>
    %14 = arith.mulf %5, %8 : vector<128x128xf32>
    %c64_i32_14 = arith.constant 64 : i32
    %15 = tpu.dynamic_rotate %5 by %c64_i32_14 dim 1 : vector<128x128xf32>, i32 -> vector<128x128xf32>
    %16 = arith.mulf %15, %9 : vector<128x128xf32>
    %17 = arith.addf %14, %16 : vector<128x128xf32>
    %18 = arith.truncf %13 : vector<128x128xf32> to vector<128x128xbf16>
    %19 = arith.truncf %17 : vector<128x128xf32> to vector<128x128xbf16>
    %cst_15 = arith.constant dense<0.000000e+00> : vector<128x128xf32>
    %20 = tpu.matmul %18, %19, %cst_15 {dimension_numbers = #tpu.dot_dimension_numbers<[1], [1], [0], [0], [0, 0, 1, 0], [], []>} : vector<128x128xbf16>, vector<128x128xbf16>, vector<128x128xf32> -> vector<128x128xf32>
    %cst_16 = arith.constant 0.0883883461 : f32
    %21 = vector.broadcast %cst_16 : f32 to vector<128x128xf32>
    %22 = arith.mulf %20, %21 : vector<128x128xf32>
    %c0_17 = arith.constant 0 : index
    %c0_18 = arith.constant 0 : index
    %23 = vector.load %arg8[%c0_17, %c0_18] : memref<128x128xf32, #tpu.memory_space<vmem>>, vector<128x128xf32>
    %24 = arith.addf %22, %23 : vector<128x128xf32>
    %cst_19 = arith.constant dense<0xFF800000> : vector<128xf32>
    %25 = vector.multi_reduction <maximumf>, %24, %cst_19 [1] : vector<128x128xf32> to vector<128xf32>
    %26 = vector.shape_cast %25 : vector<128xf32> to vector<128x1xf32>
    %27 = vector.broadcast %26 : vector<128x1xf32> to vector<128x128xf32>
    %28 = arith.subf %24, %27 : vector<128x128xf32>
    %29 = math.exp %28 : vector<128x128xf32>
    %cst_20 = arith.constant dense<0.000000e+00> : vector<128xf32>
    %30 = vector.multi_reduction <add>, %29, %cst_20 [1] : vector<128x128xf32> to vector<128xf32>
    %31 = vector.shape_cast %30 : vector<128xf32> to vector<128x1xf32>
    %32 = arith.truncf %29 : vector<128x128xf32> to vector<128x128xbf16>
    %33 = arith.truncf %7 : vector<128x128xf32> to vector<128x128xbf16>
    %cst_21 = arith.constant dense<0.000000e+00> : vector<128x128xf32>
    %34 = tpu.matmul %32, %33, %cst_21 {dimension_numbers = #tpu.dot_dimension_numbers<[1], [0], [0], [1], [0, 0, 1, 1], [], []>} : vector<128x128xbf16>, vector<128x128xbf16>, vector<128x128xf32> -> vector<128x128xf32>
    %35 = vector.broadcast %31 : vector<128x1xf32> to vector<128x128xf32>
    %36 = arith.divf %34, %35 : vector<128x128xf32>
    %c0_22 = arith.constant 0 : index
    %c0_23 = arith.constant 0 : index
    %c0_24 = arith.constant 0 : index
    %c0_25 = arith.constant 0 : index
    %37 = vector.load %arg9[%c0_22, %c0_23, %c0_24, %c0_25] : memref<1x1x128x128xf32, #tpu.memory_space<vmem>>, vector<1x1x128x128xf32>
    %38 = vector.shape_cast %37 : vector<1x1x128x128xf32> to vector<128x128xf32>
    %39 = vector.shape_cast %36 : vector<128x128xf32> to vector<1x1x128x128xf32>
    tpu.vector_store %arg9[%c0_22, %c0_23, %c0_24, %c0_25], %39 {strides = array<i32>} : memref<1x1x128x128xf32, #tpu.memory_space<vmem>>, vector<1x1x128x128xf32>,
    %c0_26 = arith.constant 0 : index
    %c0_27 = arith.constant 0 : index
    %c0_28 = arith.constant 0 : index
    %c0_29 = arith.constant 0 : index
    %40 = vector.load %arg10[%c0_26, %c0_27, %c0_28, %c0_29] : memref<1x1x128x128xf32, #tpu.memory_space<vmem>>, vector<1x1x128x128xf32>
    %41 = vector.shape_cast %40 : vector<1x1x128x128xf32> to vector<128x128xf32>
    %42 = vector.shape_cast %17 : vector<128x128xf32> to vector<1x1x128x128xf32>
    tpu.vector_store %arg10[%c0_26, %c0_27, %c0_28, %c0_29], %42 {strides = array<i32>} : memref<1x1x128x128xf32, #tpu.memory_space<vmem>>, vector<1x1x128x128xf32>,
    %c0_30 = arith.constant 0 : index
    %c0_31 = arith.constant 0 : index
    %c0_32 = arith.constant 0 : index
    %c0_33 = arith.constant 0 : index
    %43 = vector.load %arg11[%c0_30, %c0_31, %c0_32, %c0_33] : memref<1x1x128x128xf32, #tpu.memory_space<vmem>>, vector<1x1x128x128xf32>
    %44 = vector.shape_cast %43 : vector<1x1x128x128xf32> to vector<128x128xf32>
    %45 = vector.shape_cast %7 : vector<128x128xf32> to vector<1x1x128x128xf32>
    tpu.vector_store %arg11[%c0_30, %c0_31, %c0_32, %c0_33], %45 {strides = array<i32>} : memref<1x1x128x128xf32, #tpu.memory_space<vmem>>, vector<1x1x128x128xf32>,
    return
  }
  func.func @transform_0(%arg0: i32, %arg1: i32) -> (i32, i32, i32) {
    %c0_i32 = arith.constant 0 : i32
    %c0_i32_0 = arith.constant 0 : i32
    %c0_i32_1 = arith.constant 0 : i32
    return %arg1, %c0_i32, %c0_i32_0 : i32, i32, i32
  }
  func.func @transform_1(%arg0: i32, %arg1: i32) -> (i32, i32) {
    %c0_i32 = arith.constant 0 : i32
    %c0_i32_0 = arith.constant 0 : i32
    return %c0_i32, %arg0 : i32, i32
  }
  func.func @transform_2(%arg0: i32, %arg1: i32) -> (i32, i32) {
    %c0_i32 = arith.constant 0 : i32
    %c0_i32_0 = arith.constant 0 : i32
    return %c0_i32, %arg0 : i32, i32
  }
  func.func @transform_3(%arg0: i32, %arg1: i32) -> (i32, i32) {
    %c0_i32 = arith.constant 0 : i32
    %c0_i32_0 = arith.constant 0 : i32
    return %c0_i32, %arg0 : i32, i32
  }
  func.func @transform_4(%arg0: i32, %arg1: i32) -> (i32, i32) {
    %c0_i32 = arith.constant 0 : i32
    %c0_i32_0 = arith.constant 0 : i32
    %c0_i32_1 = arith.constant 0 : i32
    return %c0_i32, %c0_i32_0 : i32, i32
  }
  func.func @transform_5(%arg0: i32, %arg1: i32) -> (i32, i32) {
    %c0_i32 = arith.constant 0 : i32
    %c0_i32_0 = arith.constant 0 : i32
    %c0_i32_1 = arith.constant 0 : i32
    return %c0_i32, %c0_i32_0 : i32, i32
  }
  func.func @transform_6(%arg0: i32, %arg1: i32) -> (i32, i32) {
    %c0_i32 = arith.constant 0 : i32
    %c0_i32_0 = arith.constant 0 : i32
    %c0_i32_1 = arith.constant 0 : i32
    return %c0_i32, %c0_i32_0 : i32, i32
  }
  func.func @transform_7(%arg0: i32, %arg1: i32) -> (i32, i32, i32, i32) {
    %c0_i32 = arith.constant 0 : i32
    %c0_i32_0 = arith.constant 0 : i32
    %c0_i32_1 = arith.constant 0 : i32
    return %arg1, %arg0, %c0_i32, %c0_i32_0 : i32, i32, i32, i32
  }
  func.func @transform_8(%arg0: i32, %arg1: i32) -> (i32, i32, i32, i32) {
    %c0_i32 = arith.constant 0 : i32
    %c0_i32_0 = arith.constant 0 : i32
    %c0_i32_1 = arith.constant 0 : i32
    return %arg1, %arg0, %c0_i32, %c0_i32_0 : i32, i32, i32, i32
  }
  func.func @transform_9(%arg0: i32, %arg1: i32) -> (i32, i32, i32, i32) {
    %c0_i32 = arith.constant 0 : i32
    %c0_i32_0 = arith.constant 0 : i32
    %c0_i32_1 = arith.constant 0 : i32
    return %arg1, %arg0, %c0_i32, %c0_i32_0 : i32, i32, i32, i32
  }
}

module attributes {stable_mosaic.version = 11 : i64} {
  func.func @_out_proj_kernel(%arg0: i32, %arg1: memref<128x256xbf16, #tpu.memory_space<vmem>>, %arg2: memref<256x256xbf16, #tpu.memory_space<vmem>>, %arg3: memref<128x256xf32, #tpu.memory_space<vmem>>) attributes {dimension_semantics = [#tpu.dimension_semantics<parallel>], iteration_bounds = array<i64: 2>, scalar_prefetch = 0 : i64, scratch_operands = 0 : i64, tpu.core_type = #tpu.core_type<tc>, window_params = [{transform_indices = @transform_0, window_bounds = array<i64: 128, 256>}, {pipeline_mode = #tpu.pipeline_mode<synchronous>, transform_indices = @transform_1, window_bounds = array<i64: 256, 256>}, {transform_indices = @transform_2, window_bounds = array<i64: 128, 256>}]} {
    %c0 = arith.constant 0 : index
    %c0_0 = arith.constant 0 : index
    %0 = vector.load %arg1[%c0, %c0_0] : memref<128x256xbf16, #tpu.memory_space<vmem>>, vector<128x256xbf16>
    %c0_1 = arith.constant 0 : index
    %c0_2 = arith.constant 0 : index
    %1 = vector.load %arg2[%c0_1, %c0_2] : memref<256x256xbf16, #tpu.memory_space<vmem>>, vector<256x256xbf16>
    %cst = arith.constant dense<0.000000e+00> : vector<128x256xf32>
    %2 = tpu.matmul %0, %1, %cst {dimension_numbers = #tpu.dot_dimension_numbers<[1], [0], [0], [1], [0, 0, 1, 1], [], []>} : vector<128x256xbf16>, vector<256x256xbf16>, vector<128x256xf32> -> vector<128x256xf32>
    %c0_3 = arith.constant 0 : index
    %c0_4 = arith.constant 0 : index
    %3 = vector.load %arg3[%c0_3, %c0_4] : memref<128x256xf32, #tpu.memory_space<vmem>>, vector<128x256xf32>
    tpu.vector_store %arg3[%c0_3, %c0_4], %2 {strides = array<i32>} : memref<128x256xf32, #tpu.memory_space<vmem>>, vector<128x256xf32>,
    return
  }
  func.func @transform_0(%arg0: i32) -> (i32, i32) {
    %c0_i32 = arith.constant 0 : i32
    %c0_i32_0 = arith.constant 0 : i32
    return %arg0, %c0_i32 : i32, i32
  }
  func.func @transform_1(%arg0: i32) -> (i32, i32) {
    %c0_i32 = arith.constant 0 : i32
    %c0_i32_0 = arith.constant 0 : i32
    %c0_i32_1 = arith.constant 0 : i32
    return %c0_i32, %c0_i32_0 : i32, i32
  }
  func.func @transform_2(%arg0: i32) -> (i32, i32) {
    %c0_i32 = arith.constant 0 : i32
    %c0_i32_0 = arith.constant 0 : i32
    return %arg0, %c0_i32 : i32, i32
  }
}

</mosaic_0001>

<bundles_post_ra>
// kernel: self_attention_forward.2
= control target key start
LH: loop header
LB: loop body
LE: loop exit
PB: predicated region body
PF: predicated region fallthrough
CT: control target
= control target key end

     0   :  { %s4524_s0 = inlined_call_operand.vmem [shape: bf16[2,128,256], index: 0, kind: input, shape index: {}]   ;;  %s4525_s1 = inlined_call_operand.vmem [shape: bf16[256,256], index: 1, kind: input, shape index: {}]   ;;  %s4526_s2 = inlined_call_operand.vmem [shape: bf16[256,256], index: 2, kind: input, shape index: {}]   ;;  %s4527_s3 = inlined_call_operand.vmem [shape: bf16[256,256], index: 3, kind: input, shape index: {}]   ;;  %s4528_s4 = inlined_call_operand.vmem [shape: f32[128,128], index: 4, kind: input, shape index: {}]   ;;  %s4529_s5 = inlined_call_operand.vmem [shape: f32[128,128], index: 5, kind: input, shape index: {}]   ;;  %s4530_s6 = inlined_call_operand.vmem [shape: f32[128,128], index: 6, kind: input, shape index: {}]   ;;  %s4531_s7 = inlined_call_operand.hbm [shape: f32[2,2,128,128], index: 7, kind: output, shape index: {0}]   ;;  %s4532_s8 = inlined_call_operand.vmem [shape: f32[2,2,128,128], index: 8, kind: output, shape index: {1}]   ;;  %s4533_s9 = inlined_call_operand.vmem [shape: f32[2,2,128,128], index: 9, kind: output, shape index: {2}]  }
   0x1   :  { %4538 = sst [smem:[#allocation11_spill]] %s4531_s7 }
   0x2   :  { %15 = vsyncpa [#allocation6], 0 }
   0x3   :  { %17 = vsyncpa [#allocation6 + $0x1], 0  ;;  %s3401_s30 = smov 0   ;;  %s3403_s10 = smov 0  }
   0x4   :  { %s3405_s11 = smov 0   ;;  %s3407_s12 = smov 0  }
   0x5   :  { %s3409_s13 = smov 0   ;;  %s3411_s14 = smov 0  }
   0x6   :  { %s3413_s15 = smov 0   ;;  %s3415_s16 = smov 0  }
   0x7   :  { %s3417_s17 = smov 0   ;;  %s3419_s18 = smov 0  }
   0x8 LB: > { %4539 = sst [smem:[#allocation8_spill]] %s3337_s16  ;;  %s2627_s19 = sadd.s32 4294967295, %s3345_s18   ;;  %s3345_s18 = sphi %s3419_s18, %s23_s18   ;;  %s3341_s17 = sphi %s3417_s17, %s4555_s17   ;;  %s3337_s16 = sphi %s3415_s16, %s4547_s16   ;;  %s3333_s15 = sphi %s3413_s15, %s4554_s15   ;;  %s3329_s14 = sphi %s3411_s14, %s4546_s14   ;;  %s3325_s13 = sphi %s3409_s13, %s4553_s13   ;;  %s3321_s12 = sphi %s3407_s12, %s4552_s12   ;;  %s3317_s11 = sphi %s3405_s11, %s4551_s11   ;;  %s3313_s10 = sphi %s3403_s10, %s4550_s10   ;;  %s3309_s30 = sphi %s3401_s30, %s4549_s30  }
   0x9   : > { %s2628_s20 = sadd.s32 4294967294, %s3345_s18   ;;  %s32_s21 = sadd.s32 1, %s3337_s16 }
   0xa   : > { %s35_s22 = sadd.s32 1, %s3341_s17  ;;  %p33_p0 = scmp.ge.s32.totalorder %s32_s21, 2 }
   0xb   : > { %s68_s23 = sadd.s32 1, %s3325_s13  ;;  %p75_p1 = scmp.ne.s32.totalorder %s3325_s13, %s3321_s12 }
   0xc   : > { %p76_p2 = scmp.eq.s32.totalorder %s3345_s18, 0  ;;  %s4557_s21 = smov (%p33_p0, %s32_s21), 0 }
   0xd   : > { %4540 = sst [smem:[#allocation9_spill]] %s4557_s21  ;;  %s4559_s22 = smov (!%p33_p0, %s35_s22), %s3341_s17 }
   0xe   : > { %p3462_p3 = por %p76_p2, %p75_p1  ;;  %s206_s25 = ssub.s32 %s3337_s16, %s4557_s21 }
   0xf   : > { %p37_p4 = scmp.ge.s32.totalorder %s4559_s22, 2  ;;  %s211_s26 = sadd.s32 1, %s3317_s11 }
  0x10   : > { %p221_p5 = scmp.ne.s32.totalorder %s3317_s11, %s3313_s10  ;;  %p222_p6 = scmp.eq.s32.totalorder %s2627_s19, 3 }
  0x11   : > { %s4561_s22 = smov (%p37_p4, %s4559_s22), 0  ;;  %p227_p8 = scmp.ne.s32.totalorder %s3313_s10, %s3309_s30 }
  0x12   : > { %4542 = sst [smem:[#allocation10_spill]] %s4561_s22  ;;  %p3473_p7 = por %p222_p6, %p221_p5 }
  0x13   : > { %s65_s28 = ssub.s32 %s3341_s17, %s4561_s22  ;;  %p228_p9 = scmp.eq.s32.totalorder %s2628_s20, 3 }
  0x14   : > { %p66_p10 = scmp.eq.s32.totalorder %s65_s28, 0  ;;  %s208_s29 = sor.u32 %s206_s25, %s65_s28 }
  0x15   : > { %p209_p11 = scmp.eq.s32.totalorder %s208_s29, 0  ;;  %p3481_p12 = por %p228_p9, %p227_p8 }
  0x16   : > { %s3486_s21 = scalar_select %p66_p10, %s3325_s13, %s68_s23  }
  0x17   : > { %s3489_s19 = scalar_select %p209_p11, %s3317_s11, %s211_s26  }
  0x18   : > { %p2630_p13 = scmp.ge.s32.totalorder %s3345_s18, 4 }
  0x1a   : > { %309 = sbr.rel (%p2630_p13) target bundleno = 108 (0x6c), region = 28 }
  0x21   : > { %320 = sbr.rel (!%p3462_p3) target bundleno = 58 (0x3a), region = 36  ;;  %s322_s20 = sand.u32 (%p3462_p3), 1, %s3325_s13  }
  0x22   : > { %s2632_s22 = sshll.u32 (%p3462_p3), %s3341_s17, 2  ;;  %s2631_s25 = sshll.u32 (%p3462_p3), %s322_s20, 7 }
  0x23   : > { %s3499_s16 = scalar_lea.vmem (%p3462_p3), %s4525_s1, %s2632_s22  ;;  %s3503_s23 = scalar_lea.vmem (%p3462_p3), [#allocation2], %s2631_s25 }
  0x24   : > { %v342_v0 = vld [vmem:[%s3499_s16] sm:$0xf] (%p3462_p3)  ;;  %v344_v1 = vld [vmem:[%s3499_s16 + $0x8] sm:$0xf] (%p3462_p3)  ;;  %v346_v2 = vld [vmem:[%s3499_s16 + $0x10] sm:$0xf] (%p3462_p3) }
  0x25   : > { %343 = vst [vmem:[%s3503_s23] sm:$0xf] (%p3462_p3), %v342_v0  ;;  %345 = vst [vmem:[%s3503_s23 + $0x4] sm:$0xf] (%p3462_p3), %v344_v1  ;;  %v348_v3 = vld [vmem:[%s3499_s16 + $0x18] sm:$0xf] (%p3462_p3) }
  0x26   : > { %v350_v4 = vld [vmem:[%s3499_s16 + $0x20] sm:$0xf] (%p3462_p3)  ;;  %347 = vst [vmem:[%s3503_s23 + $0x8] sm:$0xf] (%p3462_p3), %v346_v2  ;;  %349 = vst [vmem:[%s3503_s23 + $0xc] sm:$0xf] (%p3462_p3), %v348_v3 }
  0x27   : > { %351 = vst [vmem:[%s3503_s23 + $0x10] sm:$0xf] (%p3462_p3), %v350_v4  ;;  %v352_v5 = vld [vmem:[%s3499_s16 + $0x28] sm:$0xf] (%p3462_p3)  ;;  %v354_v6 = vld [vmem:[%s3499_s16 + $0x30] sm:$0xf] (%p3462_p3) }
  0x28   : > { %v356_v7 = vld [vmem:[%s3499_s16 + $0x38] sm:$0xf]  ;;  %353 = vst [vmem:[%s3503_s23 + $0x14] sm:$0xf] %v352_v5  ;;  %355 = vst [vmem:[%s3503_s23 + $0x18] sm:$0xf] %v354_v6 }
  0x29   : > { %357 = vst [vmem:[%s3503_s23 + $0x1c] sm:$0xf] %v356_v7  ;;  %v358_v8 = vld [vmem:[%s3499_s16 + $0x40] sm:$0xf]  ;;  %v360_v9 = vld [vmem:[%s3499_s16 + $0x48] sm:$0xf] }
  0x2a   : > { %v362_v10 = vld [vmem:[%s3499_s16 + $0x50] sm:$0xf]  ;;  %359 = vst [vmem:[%s3503_s23 + $0x20] sm:$0xf] %v358_v8  ;;  %361 = vst [vmem:[%s3503_s23 + $0x24] sm:$0xf] %v360_v9 }
  0x2b   : > { %363 = vst [vmem:[%s3503_s23 + $0x28] sm:$0xf] %v362_v10  ;;  %v364_v11 = vld [vmem:[%s3499_s16 + $0x58] sm:$0xf]  ;;  %v366_v12 = vld [vmem:[%s3499_s16 + $0x60] sm:$0xf] }
  0x2c   : > { %v368_v13 = vld [vmem:[%s3499_s16 + $0x68] sm:$0xf]  ;;  %365 = vst [vmem:[%s3503_s23 + $0x2c] sm:$0xf] %v364_v11  ;;  %367 = vst [vmem:[%s3503_s23 + $0x30] sm:$0xf] %v366_v12 }
  0x2d   : > { %369 = vst [vmem:[%s3503_s23 + $0x34] sm:$0xf] %v368_v13  ;;  %v370_v14 = vld [vmem:[%s3499_s16 + $0x70] sm:$0xf]  ;;  %v372_v15 = vld [vmem:[%s3499_s16 + $0x78] sm:$0xf] }
  0x2e   : > { %v374_v16 = vld [vmem:[%s3499_s16 + $0x80] sm:$0xf]  ;;  %371 = vst [vmem:[%s3503_s23 + $0x38] sm:$0xf] %v370_v14  ;;  %373 = vst [vmem:[%s3503_s23 + $0x3c] sm:$0xf] %v372_v15 }
  0x2f   : > { %375 = vst [vmem:[%s3503_s23 + $0x40] sm:$0xf] %v374_v16  ;;  %v376_v17 = vld [vmem:[%s3499_s16 + $0x88] sm:$0xf]  ;;  %v378_v18 = vld [vmem:[%s3499_s16 + $0x90] sm:$0xf] }
  0x30   : > { %v380_v19 = vld [vmem:[%s3499_s16 + $0x98] sm:$0xf]  ;;  %377 = vst [vmem:[%s3503_s23 + $0x44] sm:$0xf] %v376_v17  ;;  %379 = vst [vmem:[%s3503_s23 + $0x48] sm:$0xf] %v378_v18 }
  0x31   : > { %381 = vst [vmem:[%s3503_s23 + $0x4c] sm:$0xf] %v380_v19  ;;  %v382_v20 = vld [vmem:[%s3499_s16 + $0xa0] sm:$0xf]  ;;  %v384_v21 = vld [vmem:[%s3499_s16 + $0xa8] sm:$0xf] }
  0x32   : > { %v386_v22 = vld [vmem:[%s3499_s16 + $0xb0] sm:$0xf]  ;;  %383 = vst [vmem:[%s3503_s23 + $0x50] sm:$0xf] %v382_v20  ;;  %385 = vst [vmem:[%s3503_s23 + $0x54] sm:$0xf] %v384_v21 }
  0x33   : > { %387 = vst [vmem:[%s3503_s23 + $0x58] sm:$0xf] %v386_v22  ;;  %v388_v23 = vld [vmem:[%s3499_s16 + $0xb8] sm:$0xf]  ;;  %v390_v24 = vld [vmem:[%s3499_s16 + $0xc0] sm:$0xf] }
  0x34   : > { %v392_v25 = vld [vmem:[%s3499_s16 + $0xc8] sm:$0xf]  ;;  %389 = vst [vmem:[%s3503_s23 + $0x5c] sm:$0xf] %v388_v23  ;;  %391 = vst [vmem:[%s3503_s23 + $0x60] sm:$0xf] %v390_v24 }
  0x35   : > { %393 = vst [vmem:[%s3503_s23 + $0x64] sm:$0xf] %v392_v25  ;;  %v394_v26 = vld [vmem:[%s3499_s16 + $0xd0] sm:$0xf]  ;;  %v396_v27 = vld [vmem:[%s3499_s16 + $0xd8] sm:$0xf] }
  0x36   : > { %v398_v28 = vld [vmem:[%s3499_s16 + $0xe0] sm:$0xf]  ;;  %395 = vst [vmem:[%s3503_s23 + $0x68] sm:$0xf] %v394_v26  ;;  %397 = vst [vmem:[%s3503_s23 + $0x6c] sm:$0xf] %v396_v27 }
  0x37   : > { %399 = vst [vmem:[%s3503_s23 + $0x70] sm:$0xf] %v398_v28  ;;  %v400_v29 = vld [vmem:[%s3499_s16 + $0xe8] sm:$0xf]  ;;  %v402_v30 = vld [vmem:[%s3499_s16 + $0xf0] sm:$0xf] }
  0x38   : > { %v404_v31 = vld [vmem:[%s3499_s16 + $0xf8] sm:$0xf]  ;;  %401 = vst [vmem:[%s3503_s23 + $0x74] sm:$0xf] %v400_v29  ;;  %403 = vst [vmem:[%s3503_s23 + $0x78] sm:$0xf] %v402_v30 }
  0x39   : > { %405 = vst [vmem:[%s3503_s23 + $0x7c] sm:$0xf] %v404_v31 }
  0x3a PF: > { %492 = sbr.rel (!%p3462_p3) target bundleno = 83 (0x53), region = 77  ;;  %s494_s22 = sand.u32 (%p3462_p3), 1, %s3325_s13  }
  0x3b   : > { %s2634_s26 = sshll.u32 (%p3462_p3), %s3341_s17, 2  ;;  %s2633_s20 = sshll.u32 (%p3462_p3), %s494_s22, 7 }
  0x3c   : > { %s3574_s29 = scalar_lea.vmem (%p3462_p3), %s4526_s2, %s2634_s26  ;;  %s3578_s16 = scalar_lea.vmem (%p3462_p3), [#allocation3], %s2633_s20 }
  0x3d   : > { %v514_v32 = vld [vmem:[%s3574_s29] sm:$0xf] (%p3462_p3)  ;;  %v516_v33 = vld [vmem:[%s3574_s29 + $0x8] sm:$0xf] (%p3462_p3)  ;;  %v518_v34 = vld [vmem:[%s3574_s29 + $0x10] sm:$0xf] (%p3462_p3) }
  0x3e   : > { %515 = vst [vmem:[%s3578_s16] sm:$0xf] (%p3462_p3), %v514_v32  ;;  %517 = vst [vmem:[%s3578_s16 + $0x4] sm:$0xf] (%p3462_p3), %v516_v33  ;;  %v520_v35 = vld [vmem:[%s3574_s29 + $0x18] sm:$0xf] (%p3462_p3) }
  0x3f   : > { %v522_v36 = vld [vmem:[%s3574_s29 + $0x20] sm:$0xf] (%p3462_p3)  ;;  %519 = vst [vmem:[%s3578_s16 + $0x8] sm:$0xf] (%p3462_p3), %v518_v34  ;;  %521 = vst [vmem:[%s3578_s16 + $0xc] sm:$0xf] (%p3462_p3), %v520_v35 }
  0x40   : > { %523 = vst [vmem:[%s3578_s16 + $0x10] sm:$0xf] (%p3462_p3), %v522_v36  ;;  %v524_v37 = vld [vmem:[%s3574_s29 + $0x28] sm:$0xf] (%p3462_p3)  ;;  %v526_v38 = vld [vmem:[%s3574_s29 + $0x30] sm:$0xf] (%p3462_p3) }
  0x41   : > { %v528_v39 = vld [vmem:[%s3574_s29 + $0x38] sm:$0xf]  ;;  %525 = vst [vmem:[%s3578_s16 + $0x14] sm:$0xf] %v524_v37  ;;  %527 = vst [vmem:[%s3578_s16 + $0x18] sm:$0xf] %v526_v38 }
  0x42   : > { %529 = vst [vmem:[%s3578_s16 + $0x1c] sm:$0xf] %v528_v39  ;;  %v530_v40 = vld [vmem:[%s3574_s29 + $0x40] sm:$0xf]  ;;  %v532_v41 = vld [vmem:[%s3574_s29 + $0x48] sm:$0xf] }
  0x43   : > { %v534_v42 = vld [vmem:[%s3574_s29 + $0x50] sm:$0xf]  ;;  %531 = vst [vmem:[%s3578_s16 + $0x20] sm:$0xf] %v530_v40  ;;  %533 = vst [vmem:[%s3578_s16 + $0x24] sm:$0xf] %v532_v41 }
  0x44   : > { %535 = vst [vmem:[%s3578_s16 + $0x28] sm:$0xf] %v534_v42  ;;  %v536_v43 = vld [vmem:[%s3574_s29 + $0x58] sm:$0xf]  ;;  %v538_v44 = vld [vmem:[%s3574_s29 + $0x60] sm:$0xf] }
  0x45   : > { %v540_v45 = vld [vmem:[%s3574_s29 + $0x68] sm:$0xf]  ;;  %537 = vst [vmem:[%s3578_s16 + $0x2c] sm:$0xf] %v536_v43  ;;  %539 = vst [vmem:[%s3578_s16 + $0x30] sm:$0xf] %v538_v44 }
  0x46   : > { %541 = vst [vmem:[%s3578_s16 + $0x34] sm:$0xf] %v540_v45  ;;  %v542_v46 = vld [vmem:[%s3574_s29 + $0x70] sm:$0xf]  ;;  %v544_v47 = vld [vmem:[%s3574_s29 + $0x78] sm:$0xf] }
  0x47   : > { %v546_v48 = vld [vmem:[%s3574_s29 + $0x80] sm:$0xf]  ;;  %543 = vst [vmem:[%s3578_s16 + $0x38] sm:$0xf] %v542_v46  ;;  %545 = vst [vmem:[%s3578_s16 + $0x3c] sm:$0xf] %v544_v47 }
  0x48   : > { %547 = vst [vmem:[%s3578_s16 + $0x40] sm:$0xf] %v546_v48  ;;  %v548_v49 = vld [vmem:[%s3574_s29 + $0x88] sm:$0xf]  ;;  %v550_v50 = vld [vmem:[%s3574_s29 + $0x90] sm:$0xf] }
  0x49   : > { %v552_v51 = vld [vmem:[%s3574_s29 + $0x98] sm:$0xf]  ;;  %549 = vst [vmem:[%s3578_s16 + $0x44] sm:$0xf] %v548_v49  ;;  %551 = vst [vmem:[%s3578_s16 + $0x48] sm:$0xf] %v550_v50 }
  0x4a   : > { %553 = vst [vmem:[%s3578_s16 + $0x4c] sm:$0xf] %v552_v51  ;;  %v554_v52 = vld [vmem:[%s3574_s29 + $0xa0] sm:$0xf]  ;;  %v556_v53 = vld [vmem:[%s3574_s29 + $0xa8] sm:$0xf] }
  0x4b   : > { %v558_v54 = vld [vmem:[%s3574_s29 + $0xb0] sm:$0xf]  ;;  %555 = vst [vmem:[%s3578_s16 + $0x50] sm:$0xf] %v554_v52  ;;  %557 = vst [vmem:[%s3578_s16 + $0x54] sm:$0xf] %v556_v53 }
  0x4c   : > { %559 = vst [vmem:[%s3578_s16 + $0x58] sm:$0xf] %v558_v54  ;;  %v560_v55 = vld [vmem:[%s3574_s29 + $0xb8] sm:$0xf]  ;;  %v562_v56 = vld [vmem:[%s3574_s29 + $0xc0] sm:$0xf] }
  0x4d   : > { %v564_v57 = vld [vmem:[%s3574_s29 + $0xc8] sm:$0xf]  ;;  %561 = vst [vmem:[%s3578_s16 + $0x5c] sm:$0xf] %v560_v55  ;;  %563 = vst [vmem:[%s3578_s16 + $0x60] sm:$0xf] %v562_v56 }
  0x4e   : > { %565 = vst [vmem:[%s3578_s16 + $0x64] sm:$0xf] %v564_v57  ;;  %v566_v58 = vld [vmem:[%s3574_s29 + $0xd0] sm:$0xf]  ;;  %v568_v59 = vld [vmem:[%s3574_s29 + $0xd8] sm:$0xf] }
  0x4f   : > { %v570_v60 = vld [vmem:[%s3574_s29 + $0xe0] sm:$0xf]  ;;  %567 = vst [vmem:[%s3578_s16 + $0x68] sm:$0xf] %v566_v58  ;;  %569 = vst [vmem:[%s3578_s16 + $0x6c] sm:$0xf] %v568_v59 }
  0x50   : > { %571 = vst [vmem:[%s3578_s16 + $0x70] sm:$0xf] %v570_v60  ;;  %v572_v61 = vld [vmem:[%s3574_s29 + $0xe8] sm:$0xf]  ;;  %v574_v62 = vld [vmem:[%s3574_s29 + $0xf0] sm:$0xf] }
  0x51   : > { %v576_v63 = vld [vmem:[%s3574_s29 + $0xf8] sm:$0xf]  ;;  %573 = vst [vmem:[%s3578_s16 + $0x74] sm:$0xf] %v572_v61  ;;  %575 = vst [vmem:[%s3578_s16 + $0x78] sm:$0xf] %v574_v62 }
  0x52   : > { %577 = vst [vmem:[%s3578_s16 + $0x7c] sm:$0xf] %v576_v63 }
  0x53 PF: > { %664 = sbr.rel (!%p3462_p3) target bundleno = 108 (0x6c), region = 118  ;;  %s666_s23 = sand.u32 (%p3462_p3), 1, %s3325_s13  }
  0x54   : > { %s2636_s22 = sshll.u32 (%p3462_p3), %s3341_s17, 2  ;;  %s2635_s26 = sshll.u32 (%p3462_p3), %s666_s23, 7 }
  0x55   : > { %s3649_s28 = scalar_lea.vmem (%p3462_p3), %s4527_s3, %s2636_s22  ;;  %s3653_s24 = scalar_lea.vmem (%p3462_p3), [#allocation4], %s2635_s26 }
  0x56   : > { %v686_v0 = vld [vmem:[%s3649_s28] sm:$0xf] (%p3462_p3)  ;;  %v688_v1 = vld [vmem:[%s3649_s28 + $0x8] sm:$0xf] (%p3462_p3)  ;;  %v690_v2 = vld [vmem:[%s3649_s28 + $0x10] sm:$0xf] (%p3462_p3) }
  0x57   : > { %687 = vst [vmem:[%s3653_s24] sm:$0xf] (%p3462_p3), %v686_v0  ;;  %689 = vst [vmem:[%s3653_s24 + $0x4] sm:$0xf] (%p3462_p3), %v688_v1  ;;  %v692_v3 = vld [vmem:[%s3649_s28 + $0x18] sm:$0xf] (%p3462_p3) }
  0x58   : > { %v694_v4 = vld [vmem:[%s3649_s28 + $0x20] sm:$0xf] (%p3462_p3)  ;;  %691 = vst [vmem:[%s3653_s24 + $0x8] sm:$0xf] (%p3462_p3), %v690_v2  ;;  %693 = vst [vmem:[%s3653_s24 + $0xc] sm:$0xf] (%p3462_p3), %v692_v3 }
  0x59   : > { %695 = vst [vmem:[%s3653_s24 + $0x10] sm:$0xf] (%p3462_p3), %v694_v4  ;;  %v696_v5 = vld [vmem:[%s3649_s28 + $0x28] sm:$0xf] (%p3462_p3)  ;;  %v698_v6 = vld [vmem:[%s3649_s28 + $0x30] sm:$0xf] (%p3462_p3) }
  0x5a   : > { %v700_v7 = vld [vmem:[%s3649_s28 + $0x38] sm:$0xf]  ;;  %697 = vst [vmem:[%s3653_s24 + $0x14] sm:$0xf] %v696_v5  ;;  %699 = vst [vmem:[%s3653_s24 + $0x18] sm:$0xf] %v698_v6 }
  0x5b   : > { %701 = vst [vmem:[%s3653_s24 + $0x1c] sm:$0xf] %v700_v7  ;;  %v702_v8 = vld [vmem:[%s3649_s28 + $0x40] sm:$0xf]  ;;  %v704_v9 = vld [vmem:[%s3649_s28 + $0x48] sm:$0xf] }
  0x5c   : > { %v706_v10 = vld [vmem:[%s3649_s28 + $0x50] sm:$0xf]  ;;  %703 = vst [vmem:[%s3653_s24 + $0x20] sm:$0xf] %v702_v8  ;;  %705 = vst [vmem:[%s3653_s24 + $0x24] sm:$0xf] %v704_v9 }
  0x5d   : > { %707 = vst [vmem:[%s3653_s24 + $0x28] sm:$0xf] %v706_v10  ;;  %v708_v11 = vld [vmem:[%s3649_s28 + $0x58] sm:$0xf]  ;;  %v710_v12 = vld [vmem:[%s3649_s28 + $0x60] sm:$0xf] }
  0x5e   : > { %v712_v13 = vld [vmem:[%s3649_s28 + $0x68] sm:$0xf]  ;;  %709 = vst [vmem:[%s3653_s24 + $0x2c] sm:$0xf] %v708_v11  ;;  %711 = vst [vmem:[%s3653_s24 + $0x30] sm:$0xf] %v710_v12 }
  0x5f   : > { %713 = vst [vmem:[%s3653_s24 + $0x34] sm:$0xf] %v712_v13  ;;  %v714_v14 = vld [vmem:[%s3649_s28 + $0x70] sm:$0xf]  ;;  %v716_v15 = vld [vmem:[%s3649_s28 + $0x78] sm:$0xf] }
  0x60   : > { %v718_v16 = vld [vmem:[%s3649_s28 + $0x80] sm:$0xf]  ;;  %715 = vst [vmem:[%s3653_s24 + $0x38] sm:$0xf] %v714_v14  ;;  %717 = vst [vmem:[%s3653_s24 + $0x3c] sm:$0xf] %v716_v15 }
  0x61   : > { %719 = vst [vmem:[%s3653_s24 + $0x40] sm:$0xf] %v718_v16  ;;  %v720_v17 = vld [vmem:[%s3649_s28 + $0x88] sm:$0xf]  ;;  %v722_v18 = vld [vmem:[%s3649_s28 + $0x90] sm:$0xf] }
  0x62   : > { %v724_v19 = vld [vmem:[%s3649_s28 + $0x98] sm:$0xf]  ;;  %721 = vst [vmem:[%s3653_s24 + $0x44] sm:$0xf] %v720_v17  ;;  %723 = vst [vmem:[%s3653_s24 + $0x48] sm:$0xf] %v722_v18 }
  0x63   : > { %725 = vst [vmem:[%s3653_s24 + $0x4c] sm:$0xf] %v724_v19  ;;  %v726_v20 = vld [vmem:[%s3649_s28 + $0xa0] sm:$0xf]  ;;  %v728_v21 = vld [vmem:[%s3649_s28 + $0xa8] sm:$0xf] }
  0x64   : > { %v730_v22 = vld [vmem:[%s3649_s28 + $0xb0] sm:$0xf]  ;;  %727 = vst [vmem:[%s3653_s24 + $0x50] sm:$0xf] %v726_v20  ;;  %729 = vst [vmem:[%s3653_s24 + $0x54] sm:$0xf] %v728_v21 }
  0x65   : > { %731 = vst [vmem:[%s3653_s24 + $0x58] sm:$0xf] %v730_v22  ;;  %v732_v23 = vld [vmem:[%s3649_s28 + $0xb8] sm:$0xf]  ;;  %v734_v24 = vld [vmem:[%s3649_s28 + $0xc0] sm:$0xf] }
  0x66   : > { %v736_v25 = vld [vmem:[%s3649_s28 + $0xc8] sm:$0xf]  ;;  %733 = vst [vmem:[%s3653_s24 + $0x5c] sm:$0xf] %v732_v23  ;;  %735 = vst [vmem:[%s3653_s24 + $0x60] sm:$0xf] %v734_v24 }
  0x67   : > { %737 = vst [vmem:[%s3653_s24 + $0x64] sm:$0xf] %v736_v25  ;;  %v738_v26 = vld [vmem:[%s3649_s28 + $0xd0] sm:$0xf]  ;;  %v740_v27 = vld [vmem:[%s3649_s28 + $0xd8] sm:$0xf] }
  0x68   : > { %v742_v28 = vld [vmem:[%s3649_s28 + $0xe0] sm:$0xf]  ;;  %739 = vst [vmem:[%s3653_s24 + $0x68] sm:$0xf] %v738_v26  ;;  %741 = vst [vmem:[%s3653_s24 + $0x6c] sm:$0xf] %v740_v27 }
  0x69   : > { %743 = vst [vmem:[%s3653_s24 + $0x70] sm:$0xf] %v742_v28  ;;  %v744_v29 = vld [vmem:[%s3649_s28 + $0xe8] sm:$0xf]  ;;  %v746_v30 = vld [vmem:[%s3649_s28 + $0xf0] sm:$0xf] }
  0x6a   : > { %v748_v31 = vld [vmem:[%s3649_s28 + $0xf8] sm:$0xf]  ;;  %745 = vst [vmem:[%s3653_s24 + $0x74] sm:$0xf] %v744_v29  ;;  %747 = vst [vmem:[%s3653_s24 + $0x78] sm:$0xf] %v746_v30 }
  0x6b   : > { %749 = vst [vmem:[%s3653_s24 + $0x7c] sm:$0xf] %v748_v31 }
  0x6c PF: > { %p2637_p0 = scmp.ge.s32.totalorder %s3345_s18, 1  ;;  %p835_p1 = scmp.lt.s32.totalorder %s3345_s18, 5 }
  0x6e   : > { %p836_p2 = pnand %p2637_p0, %p835_p1 }
  0x6f   : > { %s842_s29 = sand.u32 (!%p836_p2), 1, %s3321_s12   ;;  %p922_p3 = scmp.lt.s32.totalorder (!%p836_p2), %s3329_s14, 1 }
  0x70   : > { %839 = sbr.rel (%p836_p2) target bundleno = 1192 (0x4a8), region = 159  ;;  %s3720_s16 = sshll.u32 (!%p836_p2), %s842_s29, 7 }
  0x71   : > { %s3723_s23 = scalar_lea.vmem (!%p836_p2), [#allocation3], %s3720_s16  ;;  %s3751_s28 = scalar_lea.vmem (!%p836_p2), [#allocation2], %s3720_s16 }
  0x72   : > { %v3099_v32 = vld [vmem:[%s3723_s23 + $0x40] sm:$0xff] (!%p836_p2)   ;;  %v3101_v34 = vld [vmem:[%s3723_s23 + $0x48] sm:$0xff] (!%p836_p2)   ;;  %v3103_v36 = vld [vmem:[%s3723_s23 + $0x50] sm:$0xff] (!%p836_p2)   ;;  %s3347_s24 = smov (!%p836_p2), 64   ;;  %s3976_s29 = scalar_lea.vmem (!%p836_p2), [#allocation4], %s3720_s16 }
  0x73   : > { %v3100_v33 = vld [vmem:[%s3723_s23] sm:$0xff] (!%p836_p2)   ;;  %2785 = vmatprep.subr.bf16.mxu1 (!%p836_p2), %v3099_v32  ;;  %v3102_v35 = vld [vmem:[%s3723_s23 + $0x8] sm:$0xff] (!%p836_p2)   ;;  %v3104_v37 = vld [vmem:[%s3723_s23 + $0x10] sm:$0xff] (!%p836_p2)   ;;  %p929_p4 = scmp.lt.s32.totalorder (!%p836_p2), %s3333_s15, 1 }
  0x74   : > { %2786 = vmatpush3.bf16.msra.mxu1 (!%p836_p2), %v3100_v33  ;;  %v3105_v38 = vld [vmem:[%s3723_s23 + $0x58] sm:$0xff] (!%p836_p2)   ;;  %v3107_v40 = vld [vmem:[%s3723_s23 + $0x60] sm:$0xff] (!%p836_p2)   ;;  %v3109_v42 = vld [vmem:[%s3723_s23 + $0x68] sm:$0xff] (!%p836_p2)  }
  0x75   : > { %2787 = vmatprep.subr.bf16.mxu1 (!%p836_p2), %v3101_v34  ;;  %v3106_v39 = vld [vmem:[%s3723_s23 + $0x18] sm:$0xff] (!%p836_p2)   ;;  %v3108_v41 = vld [vmem:[%s3723_s23 + $0x20] sm:$0xff] (!%p836_p2)   ;;  %v3110_v44 = vld [vmem:[%s3723_s23 + $0x28] sm:$0xff] (!%p836_p2)  }
  0x76   : > { %v3117_v45 = vld [vmem:[%s3751_s28 + $0x40] sm:$0xff] (!%p836_p2)   ;;  %v3111_v46 = vld [vmem:[%s3723_s23 + $0x70] sm:$0xff] (!%p836_p2)   ;;  %v3120_v48 = vld [vmem:[%s3751_s28 + $0x48] sm:$0xff] (!%p836_p2)  }
  0x77   : > { %s3732_s12 = scalar_select %p922_p3, %s3329_s14, 1  ;;  %2721 = vmatprep.subr.bf16.mxu0 %v3117_v45  ;;  %v3119_v47 = vld [vmem:[%s3751_s28] sm:$0xff]   ;;  %v3121_v49 = vld [vmem:[%s3751_s28 + $0x8] sm:$0xff]   ;;  %v3112_v50 = vld [vmem:[%s3723_s23 + $0x30] sm:$0xff]  }
  0x78   : > { %2788 = vmatpush3.bf16.msra.mxu1 %v3102_v35  ;;  %2722 = vmatpush3.bf16.msra.mxu0 %v3119_v47  ;;  %v3124_v51 = vld [vmem:[%s3751_s28 + $0x50] sm:$0xff]   ;;  %v3113_v52 = vld [vmem:[%s3723_s23 + $0x78] sm:$0xff]   ;;  %v3131_v58 = vld [vmem:[%s3751_s28 + $0x60] sm:$0xff]   ;;  %s930_s16 = scalar_select %p929_p4, %s3333_s15, 1 }
  0x79   : > { %2789 = vmatprep.subr.bf16.mxu1 %v3103_v36  ;;  %s2720_s22 = sshll.u32 %s3732_s12, 7  ;;  %2723 = vmatprep.subr.bf16.mxu0 %v3120_v48  ;;  %v3126_v53 = vld [vmem:[%s3751_s28 + $0x10] sm:$0xff]   ;;  %v3127_v54 = vld [vmem:[%s3751_s28 + $0x58] sm:$0xff]   ;;  %v3133_v60 = vld [vmem:[%s3751_s28 + $0x20] sm:$0xff]  }
  0x7a   : > { %s3742_s25 = scalar_lea.vmem %s4524_s0, %s2720_s22  ;;  %v3114_v55 = vld [vmem:[%s3723_s23 + $0x38] sm:$0xff]   ;;  %v3134_v61 = vld [vmem:[%s3751_s28 + $0x68] sm:$0xff]   ;;  %v3138_v0 = vld [vmem:[%s3751_s28 + $0x70] sm:$0xff]   ;;  %s2644_s23 = sshll.u32 %s930_s16, 4 }
  0x7b   : > { %v3747_v43 = vld [vmem:[%s3742_s25 + $0x4] ss:$8 sps:$4 sm:$0xff]   ;;  %v3767_v56 = vld [vmem:[%s3742_s25] ss:$8 sps:$4 sm:$0xff]   ;;  %v3128_v57 = vld [vmem:[%s3751_s28 + $0x18] sm:$0xff]   ;;  %s2645_s22 = sshll.u32 %s3732_s12, 5 }
  0x7c   : > { %2790 = vmatpush3.bf16.msra.mxu1 %v3104_v37  ;;  %1427 = vmatprep.mubr.bf16.mxu1 %v3747_v43  ;;  %v3772_v59 = vld [vmem:[%s3742_s25 + $0x14] ss:$8 sps:$4 sm:$0xff]   ;;  %v3135_v62 = vld [vmem:[%s3751_s28 + $0x28] sm:$0xff]   ;;  %v3780_v63 = vld [vmem:[%s3742_s25 + $0x10] ss:$8 sps:$4 sm:$0xff]   ;;  %s3999_s26 = sadd.s32 %s2645_s22, %s2644_s23  ;;  %s4545_s22 = sld [smem:[#allocation11_spill]] }
  0x7d   : > { %2791 = vmatprep.subr.bf16.mxu1 %v3105_v38  ;;  %1202 = vmatprep.mubr.bf16.mxu0 %v3747_v43  ;;  %v3784_v1 = vld [vmem:[%s3742_s25 + $0x24] ss:$8 sps:$4 sm:$0xff]   ;;  %v3140_v2 = vld [vmem:[%s3751_s28 + $0x30] sm:$0xff]   ;;  %v3141_v3 = vld [vmem:[%s3751_s28 + $0x78] sm:$0xff]   ;;  %s2646_s16 = sshll.u32 %s3999_s26, 3 }
  0x7e   : > { %2724 = vmatpush3.bf16.msra.mxu0 %v3121_v49  ;;  %v3142_v4 = vld [vmem:[%s3751_s28 + $0x38] sm:$0xff]   ;;  %v3792_v5 = vld [vmem:[%s3742_s25 + $0x20] ss:$8 sps:$4 sm:$0xff]   ;;  %v3805_v8 = vld [vmem:[%s3742_s25 + $0x44] ss:$8 sps:$4 sm:$0xff]   ;;  %s4303_s12 = scalar_lea.vmem %s4533_s9, %s2646_s16 }
  0x7f   : > { %2725 = vmatprep.subr.bf16.mxu0 %v3124_v51  ;;  %v3795_v6 = vld [vmem:[%s3742_s25 + $0x34] ss:$8 sps:$4 sm:$0xff]   ;;  %v3802_v7 = vld [vmem:[%s3742_s25 + $0x30] ss:$8 sps:$4 sm:$0xff]   ;;  %v3812_v9 = vld [vmem:[%s3742_s25 + $0x40] ss:$8 sps:$4 sm:$0xff]  }
  0x80   : > { %2792 = vmatpush3.bf16.msra.mxu1 %v3106_v39  ;;  %v3815_v10 = vld [vmem:[%s3742_s25 + $0x54] ss:$8 sps:$4 sm:$0xff]   ;;  %v3822_v11 = vld [vmem:[%s3742_s25 + $0x50] ss:$8 sps:$4 sm:$0xff]   ;;  %v3825_v12 = vld [vmem:[%s3742_s25 + $0x64] ss:$8 sps:$4 sm:$0xff]  }
  0x81   : > { %2793 = vmatprep.subr.bf16.mxu1 %v3107_v40  ;;  %v3832_v13 = vld [vmem:[%s3742_s25 + $0x60] ss:$8 sps:$4 sm:$0xff]   ;;  %v3835_v14 = vld [vmem:[%s3742_s25 + $0x74] ss:$8 sps:$4 sm:$0xff]   ;;  %v3842_v15 = vld [vmem:[%s3742_s25 + $0x70] ss:$8 sps:$4 sm:$0xff]   ;;  %s4027_s25 = scalar_lea.vmem %s4532_s8, %s2646_s16 }
  0x82   : > { %2726 = vmatpush3.bf16.msra.mxu0 %v3126_v53 }
  0x83   : > { %2727 = vmatprep.subr.bf16.mxu0 %v3127_v54 }
  0x84   : > { %2794 = vmatpush3.bf16.msra.mxu1 %v3108_v41 }
  0x85   : > { %2795 = vmatprep.subr.bf16.mxu1 %v3109_v42 }
  0x86   : > { %2728 = vmatpush3.bf16.msra.mxu0 %v3128_v57 }
  0x87   : > { %2729 = vmatprep.subr.bf16.mxu0 %v3131_v58 }
  0x88   : > { %2796 = vmatpush3.bf16.msra.mxu1 %v3110_v44 }
  0x89   : > { %2797 = vmatprep.subr.bf16.mxu1 %v3111_v46 }
  0x8a   : > { %2730 = vmatpush3.bf16.msra.mxu0 %v3133_v60 }
  0x8b   : > { %2731 = vmatprep.subr.bf16.mxu0 %v3134_v61 }
  0x8c   : > { %2798 = vmatpush3.bf16.msra.mxu1 %v3112_v50 }
  0x8d   : > { %2799 = vmatprep.subr.bf16.mxu1 %v3113_v52 }
  0x8e   : > { %2732 = vmatpush3.bf16.msra.mxu0 %v3135_v62 }
  0x8f   : > { %2733 = vmatprep.subr.bf16.mxu0 %v3138_v0 }
  0x90   : > { %2800 = vmatpush3.bf16.msra.mxu1 %v3114_v55 }
  0x92   : > { %2734 = vmatpush3.bf16.msra.mxu0 %v3140_v2 }
  0x93   : > { %1428 = vmatmul.mubr.bf16.vlgmr.msra.gmra.mrb[0].mxu1 %v3767_v56  ;;  %2735 = vmatprep.subr.bf16.mxu0 %v3141_v3 }
  0x94   : > { %1435 = vmatprep.mubr.bf16.mxu1 %v3772_v59 }
  0x96   : > { %2736 = vmatpush3.bf16.msra.mxu0 %v3142_v4 }
  0x99   : > { %1203 = vmatmul.mubr.bf16.vlgmr.msra.gmra.mrb[0].mxu0 %v3767_v56 }
  0x9a   : > { %1210 = vmatprep.mubr.bf16.mxu0 %v3772_v59 }
  0x9b   : > { %1436 = vmatmul.mubr.bf16.gmra.mrb[4].mxu1 %v3780_v63 }
  0x9c   : > { %1443 = vmatprep.mubr.bf16.mxu1 %v3784_v1 }
  0xa1   : > { %1211 = vmatmul.mubr.bf16.gmra.mrb[4].mxu0 %v3780_v63 }
  0xa2   : > { %1218 = vmatprep.mubr.bf16.mxu0 %v3784_v1 }
  0xa3   : > { %1444 = vmatmul.mubr.bf16.gmra.mrb[8].mxu1 %v3792_v5 }
  0xa4   : > { %1451 = vmatprep.mubr.bf16.mxu1 %v3795_v6 }
  0xa9   : > { %1219 = vmatmul.mubr.bf16.gmra.mrb[8].mxu0 %v3792_v5 }
  0xaa   : > { %1226 = vmatprep.mubr.bf16.mxu0 %v3795_v6 }
  0xab   : > { %1452 = vmatmul.mubr.bf16.gmra.mrb[12].mxu1 %v3802_v7 }
  0xac   : > { %1459 = vmatprep.mubr.bf16.mxu1 %v3805_v8 }
  0xb1   : > { %1227 = vmatmul.mubr.bf16.gmra.mrb[12].mxu0 %v3802_v7 }
  0xb2   : > { %1234 = vmatprep.mubr.bf16.mxu0 %v3805_v8 }
  0xb3   : > { %1460 = vmatmul.mubr.bf16.gmra.mrb[16].mxu1 %v3812_v9 }
  0xb4   : > { %1467 = vmatprep.mubr.bf16.mxu1 %v3815_v10 }
  0xb9   : > { %1235 = vmatmul.mubr.bf16.gmra.mrb[16].mxu0 %v3812_v9 }
  0xba   : > { %1242 = vmatprep.mubr.bf16.mxu0 %v3815_v10 }
  0xbb   : > { %1468 = vmatmul.mubr.bf16.gmra.mrb[20].mxu1 %v3822_v11 }
  0xbc   : > { %1475 = vmatprep.mubr.bf16.mxu1 %v3825_v12 }
  0xc1   : > { %1243 = vmatmul.mubr.bf16.gmra.mrb[20].mxu0 %v3822_v11 }
  0xc2   : > { %1250 = vmatprep.mubr.bf16.mxu0 %v3825_v12 }
  0xc3   : > { %1476 = vmatmul.mubr.bf16.gmra.mrb[24].mxu1 %v3832_v13 }
  0xc4   : > { %1483 = vmatprep.mubr.bf16.mxu1 %v3835_v14 }
  0xc9   : > { %1251 = vmatmul.mubr.bf16.gmra.mrb[24].mxu0 %v3832_v13 }
  0xca   : > { %1258 = vmatprep.mubr.bf16.mxu0 %v3835_v14 }
  0xcb   : > { %1484 = vmatmul.mubr.bf16.gmra.mrb[28].mxu1 %v3842_v15 }
  0xd1   : > { %1259 = vmatmul.mubr.bf16.gmra.mrb[28].mxu0 %v3842_v15 }
  0xd2   : > { %1652 = vmatprep.mubr.bf16.mxu0 %v3747_v43 }
 0x166   : > { %v2801_v16 = vpop.f32.mrb[0].mxu1 }
 0x167   : > { %v2802_v17 = vpop.f32.mrb[1].mxu1 }
 0x168   : > { %v3851_v18 = vadd.f32 %v2802_v17, %v2801_v16  ;;  %v2804_v19 = vpop.f32.mrb[2].mxu1 }
 0x169   : > { %v2805_v20 = vpop.f32.mrb[3].mxu1 }
 0x16a   : > { %v3853_v21 = vadd.f32 %v2805_v20, %v2804_v19  ;;  %1845 = vrot.lane.b32.xlu0 %v3851_v18, %s3347_s24 }
 0x16c   : > { %v2737_v32 = vpop.f32.mrb[0].mxu0 }
 0x16d   : > { %v2738_v34 = vpop.f32.mrb[1].mxu0 }
 0x16e   : > { %v2807_v22 = vpop.f32.mrb[4].mxu1  ;;  %1847 = vrot.lane.b32.xlu0 %v3853_v21, %s3347_s24  ;;  %v3873_v36 = vadd.f32 %v2738_v34, %v2737_v32  ;;  %v2740_v37 = vpop.f32.mrb[2].mxu0 }
 0x16f   : > { %v2808_v23 = vpop.f32.mrb[5].mxu1  ;;  %v2741_v38 = vpop.f32.mrb[3].mxu0 }
 0x170   : > { %v3859_v24 = vadd.f32 %v2808_v23, %v2807_v22  ;;  %v2810_v25 = vpop.f32.mrb[6].mxu1  ;;  %v3877_v39 = vadd.f32 %v2741_v38, %v2740_v37 }
 0x171   : > { %v2811_v26 = vpop.f32.mrb[7].mxu1 }
 0x172   : > { %v3861_v27 = vadd.f32 %v2811_v26, %v2810_v25  ;;  %1849 = vrot.lane.b32.xlu1 %v3859_v24, %s3347_s24 }
 0x174   : > { %v2743_v44 = vpop.f32.mrb[4].mxu0 }
 0x175   : > { %v2744_v46 = vpop.f32.mrb[5].mxu0 }
 0x176   : > { %v2813_v28 = vpop.f32.mrb[8].mxu1  ;;  %1851 = vrot.lane.b32.xlu1 %v3861_v27, %s3347_s24  ;;  %v3885_v48 = vadd.f32 %v2744_v46, %v2743_v44  ;;  %v2746_v49 = vpop.f32.mrb[6].mxu0 }
 0x177   : > { %v2814_v29 = vpop.f32.mrb[9].mxu1  ;;  %v2747_v50 = vpop.f32.mrb[7].mxu0 }
 0x178   : > { %v3867_v30 = vadd.f32 %v2814_v29, %v2813_v28  ;;  %v2816_v31 = vpop.f32.mrb[10].mxu1  ;;  %v3889_v51 = vadd.f32 %v2747_v50, %v2746_v49 }
 0x179   : > { %v2817_v33 = vpop.f32.mrb[11].mxu1 }
 0x17a   : > { %v3869_v35 = vadd.f32 %v2817_v33, %v2816_v31  ;;  %1853 = vrot.lane.b32.xlu0 %v3867_v30, %s3347_s24 }
 0x17c   : > { %1855 = vrot.lane.b32.xlu1 %v3869_v35, %s3347_s24  ;;  %v2749_v57 = vpop.f32.mrb[8].mxu0 }
 0x17d   : > { %v2750_v60 = vpop.f32.mrb[9].mxu0 }
 0x17e   : > { %v2819_v40 = vpop.f32.mrb[12].mxu1  ;;  %v3897_v62 = vadd.f32 %v2750_v60, %v2749_v57  ;;  %v2752_v0 = vpop.f32.mrb[10].mxu0 }
 0x17f   : > { %v2820_v41 = vpop.f32.mrb[13].mxu1  ;;  %v2753_v2 = vpop.f32.mrb[11].mxu0 }
 0x180   : > { %v3879_v42 = vadd.f32 %v2820_v41, %v2819_v40  ;;  %v2822_v43 = vpop.f32.mrb[14].mxu1  ;;  %v3901_v3 = vadd.f32 %v2753_v2, %v2752_v0 }
 0x181   : > { %v2823_v45 = vpop.f32.mrb[15].mxu1 }
 0x182   : > { %v3881_v47 = vadd.f32 %v2823_v45, %v2822_v43  ;;  %1857 = vrot.lane.b32.xlu0 %v3879_v42, %s3347_s24 }
 0x184   : > { %1859 = vrot.lane.b32.xlu1 %v3881_v47, %s3347_s24  ;;  %v2755_v20 = vpop.f32.mrb[12].mxu0 }
 0x185   : > { %v2756_v23 = vpop.f32.mrb[13].mxu0 }
 0x186   : > { %v2825_v52 = vpop.f32.mrb[16].mxu1  ;;  %v3909_v26 = vadd.f32 %v2756_v23, %v2755_v20  ;;  %v2758_v28 = vpop.f32.mrb[14].mxu0 }
 0x187   : > { %v2826_v53 = vpop.f32.mrb[17].mxu1  ;;  %v2759_v29 = vpop.f32.mrb[15].mxu0 }
 0x188   : > { %v3891_v54 = vadd.f32 %v2826_v53, %v2825_v52  ;;  %v2828_v55 = vpop.f32.mrb[18].mxu1  ;;  %v3913_v31 = vadd.f32 %v2759_v29, %v2758_v28 }
 0x189   : > { %v2829_v58 = vpop.f32.mrb[19].mxu1 }
 0x18a   : > { %v3893_v61 = vadd.f32 %v2829_v58, %v2828_v55  ;;  %1861 = vrot.lane.b32.xlu0 %v3891_v54, %s3347_s24 }
 0x18c   : > { %1863 = vrot.lane.b32.xlu1 %v3893_v61, %s3347_s24  ;;  %v2761_v38 = vpop.f32.mrb[16].mxu0 }
 0x18d   : > { %v2762_v41 = vpop.f32.mrb[17].mxu0 }
 0x18e   : > { %v2831_v4 = vpop.f32.mrb[20].mxu1  ;;  %v3921_v44 = vadd.f32 %v2762_v41, %v2761_v38  ;;  %v2764_v45 = vpop.f32.mrb[18].mxu0 }
 0x18f   : > { %v2832_v16 = vpop.f32.mrb[21].mxu1  ;;  %v2765_v46 = vpop.f32.mrb[19].mxu0 }
 0x190   : > { %v3903_v17 = vadd.f32 %v2832_v16, %v2831_v4  ;;  %v2834_v19 = vpop.f32.mrb[22].mxu1  ;;  %v3925_v49 = vadd.f32 %v2765_v46, %v2764_v45  ;;  %v3155_v46 = vld [vmem:[%s3976_s29 + $0x40] sm:$0xff]  }
 0x191   : > { %v2835_v22 = vpop.f32.mrb[23].mxu1  ;;  %2849 = vmatprep.subr.bf16.mxu0 %v3155_v46  ;;  %v3170_v46 = vld [vmem:[%s3976_s29 + $0x38] sm:$0xff]  }
 0x192   : > { %v3905_v25 = vadd.f32 %v2835_v22, %v2834_v19  ;;  %1865 = vrot.lane.b32.xlu0 %v3903_v17, %s3347_s24 }
 0x194   : > { %1867 = vrot.lane.b32.xlu1 %v3905_v25, %s3347_s24  ;;  %v2767_v57 = vpop.f32.mrb[20].mxu0 }
 0x195   : > { %v2768_v60 = vpop.f32.mrb[21].mxu0 }
 0x196   : > { %v2837_v32 = vpop.f32.mrb[24].mxu1  ;;  %v3933_v2 = vadd.f32 %v2768_v60, %v2767_v57  ;;  %v2770_v4 = vpop.f32.mrb[22].mxu0  ;;  %v3159_v57 = vld [vmem:[%s3976_s29 + $0x50] sm:$0xff]   ;;  %v3161_v60 = vld [vmem:[%s3976_s29 + $0x58] sm:$0xff]  }
 0x197   : > { %v2838_v33 = vpop.f32.mrb[25].mxu1  ;;  %v2771_v16 = vpop.f32.mrb[23].mxu0 }
 0x198   : > { %v3915_v34 = vadd.f32 %v2838_v33, %v2837_v32  ;;  %v2840_v37 = vpop.f32.mrb[26].mxu1  ;;  %v3937_v19 = vadd.f32 %v2771_v16, %v2770_v4  ;;  %v3162_v4 = vld [vmem:[%s3976_s29 + $0x18] sm:$0xff]   ;;  %v3163_v16 = vld [vmem:[%s3976_s29 + $0x60] sm:$0xff]  }
 0x199   : > { %v2841_v40 = vpop.f32.mrb[27].mxu1 }
 0x19a   : > { %v3917_v43 = vadd.f32 %v2841_v40, %v2840_v37  ;;  %1869 = vrot.lane.b32.xlu0 %v3915_v34, %s3347_s24 }
 0x19c   : > { %1871 = vrot.lane.b32.xlu1 %v3917_v43, %s3347_s24  ;;  %v2773_v20 = vpop.f32.mrb[24].mxu0 }
 0x19d   : > { %v2774_v22 = vpop.f32.mrb[25].mxu0 }
 0x19e   : > { %v2843_v50 = vpop.f32.mrb[28].mxu1  ;;  %v3945_v23 = vadd.f32 %v2774_v22, %v2773_v20  ;;  %v2776_v28 = vpop.f32.mrb[26].mxu0  ;;  %v3164_v20 = vld [vmem:[%s3976_s29 + $0x20] sm:$0xff]   ;;  %v3165_v22 = vld [vmem:[%s3976_s29 + $0x68] sm:$0xff]  }
 0x19f   : > { %v2844_v52 = vpop.f32.mrb[29].mxu1  ;;  %v2777_v29 = vpop.f32.mrb[27].mxu0 }
 0x1a0   : > { %v3927_v53 = vadd.f32 %v2844_v52, %v2843_v50  ;;  %v2846_v55 = vpop.f32.mrb[30].mxu1  ;;  %v3949_v32 = vadd.f32 %v2777_v29, %v2776_v28  ;;  %v3156_v50 = vld [vmem:[%s3976_s29] sm:$0xff]   ;;  %v3157_v52 = vld [vmem:[%s3976_s29 + $0x48] sm:$0xff]   ;;  %v3167_v29 = vld [vmem:[%s3976_s29 + $0x70] sm:$0xff]  }
 0x1a1   : > { %v2847_v58 = vpop.f32.mrb[31].mxu1  ;;  %2850 = vmatpush3.bf16.msra.mxu0 %v3156_v50  ;;  %v3166_v28 = vld [vmem:[%s3976_s29 + $0x28] sm:$0xff]  }
 0x1a2   : > { %v3929_v0 = vadd.f32 %v2847_v58, %v2846_v55  ;;  %1873 = vrot.lane.b32.xlu0 %v3927_v53, %s3347_s24  ;;  %v3158_v55 = vld [vmem:[%s3976_s29 + $0x8] sm:$0xff]   ;;  %2851 = vmatprep.subr.bf16.mxu0 %v3157_v52  ;;  %v3160_v58 = vld [vmem:[%s3976_s29 + $0x10] sm:$0xff]  }
 0x1a4   : > { %1875 = vrot.lane.b32.xlu1 %v3929_v0, %s3347_s24  ;;  %v2779_v33 = vpop.f32.mrb[28].mxu0 }
 0x1a5   : > { %v2780_v37 = vpop.f32.mrb[29].mxu0  ;;  %2852 = vmatpush3.bf16.msra.mxu0 %v3158_v55 }
 0x1a6   : > { %1765 = vrot.lane.b32.xlu0 %v3873_v36, %s3347_s24  ;;  %v3957_v38 = vadd.f32 %v2780_v37, %v2779_v33  ;;  %v2782_v40 = vpop.f32.mrb[30].mxu0  ;;  %2853 = vmatprep.subr.bf16.mxu0 %v3159_v57  ;;  %v3168_v33 = vld [vmem:[%s3976_s29 + $0x30] sm:$0xff]   ;;  %v3169_v37 = vld [vmem:[%s3976_s29 + $0x78] sm:$0xff]   ;;  %v4020_v57 = vld [vmem:[%s4528_s4 + $0x8] sm:$0xff] }
 0x1a7   : > { %v2783_v41 = vpop.f32.mrb[31].mxu0 }
 0x1a8   : > { %1767 = vrot.lane.b32.xlu1 %v3877_v39, %s3347_s24  ;;  %v3961_v45 = vadd.f32 %v2783_v41, %v2782_v40  ;;  %v4005_v40 = vld [vmem:[%s4528_s4] sm:$0xff] }
 0x1a9   : > { %2854 = vmatpush3.bf16.msra.mxu0 %v3160_v58  ;;  %v4010_v41 = vld [vmem:[%s4529_s5] sm:$0xff]  ;;  %v1829_v52 = vmul.f32 %v3851_v18, %v4005_v40  ;;  %v4032_v58 = vld [vmem:[%s4529_s5 + $0x8] sm:$0xff] }
 0x1aa   : > { %1769 = vrot.lane.b32.xlu0 %v3885_v48, %s3347_s24  ;;  %2855 = vmatprep.subr.bf16.mxu0 %v3161_v60 }
 0x1ac   : > { %1771 = vrot.lane.b32.xlu1 %v3889_v51, %s3347_s24 }
 0x1ad   : > { %2856 = vmatpush3.bf16.msra.mxu0 %v3162_v4  ;;  %v1830_v4 = vmul.f32 %v3853_v21, %v4020_v57 }
 0x1ae   : > { %1773 = vrot.lane.b32.xlu0 %v3897_v62, %s3347_s24  ;;  %2857 = vmatprep.subr.bf16.mxu0 %v3163_v16 }
 0x1b0   : > { %1775 = vrot.lane.b32.xlu1 %v3901_v3, %s3347_s24 }
 0x1b1   : > { %2858 = vmatpush3.bf16.msra.mxu0 %v3164_v20  ;;  %v4041_v20 = vld [vmem:[%s4528_s4 + $0x10] sm:$0xff] }
 0x1b2   : > { %1777 = vrot.lane.b32.xlu0 %v3909_v26, %s3347_s24  ;;  %2859 = vmatprep.subr.bf16.mxu0 %v3165_v22  ;;  %v4046_v22 = vld [vmem:[%s4529_s5 + $0x10] sm:$0xff] }
 0x1b4   : > { %1779 = vrot.lane.b32.xlu1 %v3913_v31, %s3347_s24 }
 0x1b5   : > { %2860 = vmatpush3.bf16.msra.mxu0 %v3166_v28 }
 0x1b6   : > { %1781 = vrot.lane.b32.xlu0 %v3921_v44, %s3347_s24  ;;  %2861 = vmatprep.subr.bf16.mxu0 %v3167_v29  ;;  %v1831_v29 = vmul.f32 %v3859_v24, %v4041_v20 }
 0x1b8   : > { %1783 = vrot.lane.b32.xlu1 %v3925_v49, %s3347_s24 }
 0x1b9   : > { %2862 = vmatpush3.bf16.msra.mxu0 %v3168_v33 }
 0x1ba   : > { %1785 = vrot.lane.b32.xlu0 %v3933_v2, %s3347_s24  ;;  %2863 = vmatprep.subr.bf16.mxu0 %v3169_v37 }
 0x1bc   : > { %1787 = vrot.lane.b32.xlu1 %v3937_v19, %s3347_s24 }
 0x1bd   : > { %2864 = vmatpush3.bf16.msra.mxu0 %v3170_v46  ;;  %v4057_v46 = vld [vmem:[%s4528_s4 + $0x18] sm:$0xff] }
 0x1be   : > { %1789 = vrot.lane.b32.xlu0 %v3945_v23, %s3347_s24  ;;  %v1832_v24 = vmul.f32 %v3861_v27, %v4057_v46  ;;  %v4083_v27 = vld [vmem:[%s4528_s4 + $0x28] sm:$0xff] }
 0x1c0   : > { %1791 = vrot.lane.b32.xlu1 %v3949_v32, %s3347_s24  ;;  %1653 = vmatmul.mubr.bf16.vlgmr.msra.gmra.mrb[32].mxu0 %v3767_v56  ;;  %v4062_v56 = vld [vmem:[%s4529_s5 + $0x18] sm:$0xff] }
 0x1c1   : > { %1660 = vmatprep.mubr.bf16.mxu0 %v3772_v59 }
 0x1c2   : > { %1793 = vrot.lane.b32.xlu0 %v3957_v38, %s3347_s24 }
 0x1c4   : > { %1795 = vrot.lane.b32.xlu1 %v3961_v45, %s3347_s24  ;;  %s2716_s24 = sshll.u32 %s3329_s14, 5 }
 0x1c8   : > { %1661 = vmatmul.mubr.bf16.gmra.mrb[36].mxu0 %v3780_v63 }
 0x1c9   : > { %1668 = vmatprep.mubr.bf16.mxu0 %v3784_v1 }
 0x1d0   : > { %1669 = vmatmul.mubr.bf16.gmra.mrb[40].mxu0 %v3792_v5 }
 0x1d1   : > { %1676 = vmatprep.mubr.bf16.mxu0 %v3795_v6 }
 0x1d8   : > { %1677 = vmatmul.mubr.bf16.gmra.mrb[44].mxu0 %v3802_v7 }
 0x1d9   : > { %1684 = vmatprep.mubr.bf16.mxu0 %v3805_v8 }
 0x1dc   : > { %v1846_v50 = vpop.permute.xlu0 %1845 }
 0x1dd   : > { %v1877_v55 = vmul.f32 %v1846_v50, %v4010_v41 }
 0x1df   : > { %v1893_v18 = vadd.f32 %v1877_v55, %v1829_v52  ;;  %v4071_v55 = vld [vmem:[%s4528_s4 + $0x20] sm:$0xff] }
 0x1e0   : > { %v1848_v60 = vpop.permute.xlu0 %1847  ;;  %1685 = vmatmul.mubr.bf16.gmra.mrb[48].mxu0 %v3812_v9 }
 0x1e1   : > { %2343 = vst [vmem:[%s4027_s25] sm:$0xff] %v1893_v18  ;;  %v1878_v16 = vmul.f32 %v1848_v60, %v4032_v58  ;;  %1692 = vmatprep.mubr.bf16.mxu0 %v3815_v10 }
 0x1e3   : > { %v1894_v28 = vadd.f32 %v1878_v16, %v1830_v4  ;;  %v4088_v16 = vld [vmem:[%s4529_s5 + $0x28] sm:$0xff] }
 0x1e4   : > { %v1850_v21 = vpop.permute.xlu1 %1849 }
 0x1e5   : > { %2344 = vst [vmem:[%s4027_s25 + $0x8] sm:$0xff] %v1894_v28  ;;  %v1879_v33 = vmul.f32 %v1850_v21, %v4046_v22  ;;  %v1917_v37 = vpack.c.bf16 %v1894_v28, %v1893_v18  ;;  %v4076_v18 = vld [vmem:[%s4529_s5 + $0x20] sm:$0xff]  ;;  %v1833_v28 = vmul.f32 %v3867_v30, %v4071_v55  ;;  %v4106_v30 = vld [vmem:[%s4529_s5 + $0x30] sm:$0xff] }
 0x1e7   : > { %v1895_v50 = vadd.f32 %v1879_v33, %v1831_v29  ;;  %2945 = vmatprep.subr.bf16.mxu1 %v1917_v37  ;;  %v1834_v29 = vmul.f32 %v3869_v35, %v4083_v27 }
 0x1e8   : > { %v1852_v59 = vpop.permute.xlu1 %1851  ;;  %2946 = vmatpush3.bf16.xpose.msra.mxu1 %v1917_v37  ;;  %1693 = vmatmul.mubr.bf16.gmra.mrb[52].mxu0 %v3822_v11 }
 0x1e9   : > { %2345 = vst [vmem:[%s4027_s25 + $0x10] sm:$0xff] %v1895_v50  ;;  %v1880_v52 = vmul.f32 %v1852_v59, %v4062_v56  ;;  %1700 = vmatprep.mubr.bf16.mxu0 %v3825_v12 }
 0x1eb   : > { %v1896_v60 = vadd.f32 %v1880_v52, %v1832_v24  ;;  %v4101_v24 = vld [vmem:[%s4528_s4 + $0x30] sm:$0xff] }
 0x1ec   : > { %v1854_v4 = vpop.permute.xlu0 %1853 }
 0x1ed   : > { %2346 = vst [vmem:[%s4027_s25 + $0x18] sm:$0xff] %v1896_v60  ;;  %v1881_v63 = vmul.f32 %v1854_v4, %v4076_v18  ;;  %v1918_v21 = vpack.c.bf16 %v1896_v60, %v1895_v50  ;;  %v4114_v50 = vld [vmem:[%s4528_s4 + $0x38] sm:$0xff]  ;;  %v1835_v4 = vmul.f32 %v3879_v42, %v4101_v24  ;;  %v4136_v42 = vld [vmem:[%s4529_s5 + $0x40] sm:$0xff] }
 0x1ee   : > { %v1856_v1 = vpop.permute.xlu1 %1855  ;;  %v4119_v60 = vld [vmem:[%s4529_s5 + $0x38] sm:$0xff]  ;;  %v1836_v6 = vmul.f32 %v3881_v47, %v4114_v50 }
 0x1ef   : > { %v1897_v33 = vadd.f32 %v1881_v63, %v1833_v28  ;;  %v1882_v37 = vmul.f32 %v1856_v1, %v4088_v16  ;;  %2947 = vmatprep.subr.bf16.mxu1 %v1918_v21 }
 0x1f0   : > { %2948 = vmatpush3.bf16.xpose.msra.mxu1 %v1918_v21  ;;  %1701 = vmatmul.mubr.bf16.gmra.mrb[56].mxu0 %v3832_v13 }
 0x1f1   : > { %2347 = vst [vmem:[%s4027_s25 + $0x20] sm:$0xff] %v1897_v33  ;;  %v1898_v59 = vadd.f32 %v1882_v37, %v1834_v29  ;;  %v4131_v29 = vld [vmem:[%s4528_s4 + $0x40] sm:$0xff]  ;;  %1708 = vmatprep.mubr.bf16.mxu0 %v3835_v14 }
 0x1f3   : > { %2348 = vst [vmem:[%s4027_s25 + $0x28] sm:$0xff] %v1898_v59  ;;  %v1919_v35 = vpack.c.bf16 %v1898_v59, %v1897_v33  ;;  %v4144_v33 = vld [vmem:[%s4528_s4 + $0x48] sm:$0xff] }
 0x1f4   : > { %v1858_v52 = vpop.permute.xlu0 %1857  ;;  %v4149_v59 = vld [vmem:[%s4529_s5 + $0x48] sm:$0xff]  ;;  %v1838_v8 = vmul.f32 %v3893_v61, %v4144_v33 }
 0x1f5   : > { %v1883_v5 = vmul.f32 %v1858_v52, %v4106_v30  ;;  %2949 = vmatprep.subr.bf16.mxu1 %v1919_v35 }
 0x1f6   : > { %v1860_v28 = vpop.permute.xlu1 %1859 }
 0x1f7   : > { %v1899_v63 = vadd.f32 %v1883_v5, %v1835_v4  ;;  %v1884_v21 = vmul.f32 %v1860_v28, %v4119_v60 }
 0x1f8   : > { %2950 = vmatpush3.bf16.xpose.msra.mxu1 %v1919_v35  ;;  %v1837_v35 = vmul.f32 %v3891_v54, %v4131_v29  ;;  %v4166_v54 = vld [vmem:[%s4529_s5 + $0x50] sm:$0xff]  ;;  %1709 = vmatmul.mubr.bf16.gmra.mrb[60].mxu0 %v3842_v15  ;;  %v1751_v15 = vmul.f32 %v3885_v48, %v4041_v20  ;;  %v1754_v48 = vmul.f32 %v3901_v3, %v4083_v27 }
 0x1f9   : > { %2349 = vst [vmem:[%s4027_s25 + $0x30] sm:$0xff] %v1899_v63  ;;  %v1900_v1 = vadd.f32 %v1884_v21, %v1836_v6  ;;  %v4161_v6 = vld [vmem:[%s4528_s4 + $0x50] sm:$0xff] }
 0x1fb   : > { %2350 = vst [vmem:[%s4027_s25 + $0x38] sm:$0xff] %v1900_v1  ;;  %v1920_v47 = vpack.c.bf16 %v1900_v1, %v1899_v63  ;;  %v4174_v63 = vld [vmem:[%s4528_s4 + $0x58] sm:$0xff] }
 0x1fc   : > { %v1862_v37 = vpop.permute.xlu0 %1861  ;;  %v4179_v1 = vld [vmem:[%s4529_s5 + $0x58] sm:$0xff]  ;;  %v1840_v10 = vmul.f32 %v3905_v25, %v4174_v63 }
 0x1fd   : > { %v1885_v7 = vmul.f32 %v1862_v37, %v4136_v42  ;;  %2951 = vmatprep.subr.bf16.mxu1 %v1920_v47 }
 0x1fe   : > { %v1864_v52 = vpop.permute.xlu1 %1863 }
 0x1ff   : > { %v1901_v4 = vadd.f32 %v1885_v7, %v1837_v35  ;;  %v1886_v5 = vmul.f32 %v1864_v52, %v4149_v59 }
 0x200   : > { %2952 = vmatpush3.bf16.xpose.msra.mxu1 %v1920_v47  ;;  %v1839_v47 = vmul.f32 %v3903_v17, %v4161_v6  ;;  %v4196_v17 = vld [vmem:[%s4529_s5 + $0x60] sm:$0xff] }
 0x201   : > { %2351 = vst [vmem:[%s4027_s25 + $0x40] sm:$0xff] %v1901_v4  ;;  %v1902_v28 = vadd.f32 %v1886_v5, %v1838_v8  ;;  %v4191_v8 = vld [vmem:[%s4528_s4 + $0x60] sm:$0xff] }
 0x203   : > { %2352 = vst [vmem:[%s4027_s25 + $0x48] sm:$0xff] %v1902_v28  ;;  %v1921_v61 = vpack.c.bf16 %v1902_v28, %v1901_v4  ;;  %v4204_v4 = vld [vmem:[%s4528_s4 + $0x68] sm:$0xff] }
 0x204   : > { %v1866_v21 = vpop.permute.xlu0 %1865  ;;  %v4209_v28 = vld [vmem:[%s4529_s5 + $0x68] sm:$0xff]  ;;  %v1842_v12 = vmul.f32 %v3917_v43, %v4204_v4 }
 0x205   : > { %v1887_v9 = vmul.f32 %v1866_v21, %v4166_v54  ;;  %2953 = vmatprep.subr.bf16.mxu1 %v1921_v61 }
 0x206   : > { %v1868_v37 = vpop.permute.xlu1 %1867 }
 0x207   : > { %v1903_v35 = vadd.f32 %v1887_v9, %v1839_v47  ;;  %v1888_v7 = vmul.f32 %v1868_v37, %v4179_v1 }
 0x208   : > { %2954 = vmatpush3.bf16.xpose.msra.mxu1 %v1921_v61  ;;  %v1841_v61 = vmul.f32 %v3915_v34, %v4191_v8  ;;  %v4226_v34 = vld [vmem:[%s4529_s5 + $0x70] sm:$0xff] }
 0x209   : > { %2353 = vst [vmem:[%s4027_s25 + $0x50] sm:$0xff] %v1903_v35  ;;  %v1904_v52 = vadd.f32 %v1888_v7, %v1840_v10  ;;  %v4221_v10 = vld [vmem:[%s4528_s4 + $0x70] sm:$0xff] }
 0x20b   : > { %2354 = vst [vmem:[%s4027_s25 + $0x58] sm:$0xff] %v1904_v52  ;;  %v1922_v25 = vpack.c.bf16 %v1904_v52, %v1903_v35  ;;  %v4234_v35 = vld [vmem:[%s4528_s4 + $0x78] sm:$0xff] }
 0x20c   : > { %v1870_v5 = vpop.permute.xlu0 %1869  ;;  %v4239_v52 = vld [vmem:[%s4529_s5 + $0x78] sm:$0xff]  ;;  %v1844_v14 = vmul.f32 %v3929_v0, %v4234_v35 }
 0x20d   : > { %v1889_v11 = vmul.f32 %v1870_v5, %v4196_v17  ;;  %2955 = vmatprep.subr.bf16.mxu1 %v1922_v25 }
 0x20e   : > { %v1872_v21 = vpop.permute.xlu1 %1871 }
 0x20f   : > { %v1905_v47 = vadd.f32 %v1889_v11, %v1841_v61  ;;  %v1890_v9 = vmul.f32 %v1872_v21, %v4209_v28 }
 0x210   : > { %2956 = vmatpush3.bf16.xpose.msra.mxu1 %v1922_v25  ;;  %v1843_v25 = vmul.f32 %v3927_v53, %v4221_v10  ;;  %v1749_v53 = vmul.f32 %v3873_v36, %v4005_v40  ;;  %v1752_v36 = vmul.f32 %v3889_v51, %v4057_v46 }
 0x211   : > { %2355 = vst [vmem:[%s4027_s25 + $0x60] sm:$0xff] %v1905_v47  ;;  %v1906_v37 = vadd.f32 %v1890_v9, %v1842_v12 }
 0x213   : > { %2356 = vst [vmem:[%s4027_s25 + $0x68] sm:$0xff] %v1906_v37  ;;  %v1923_v43 = vpack.c.bf16 %v1906_v37, %v1905_v47  ;;  %v1750_v37 = vmul.f32 %v3877_v39, %v4020_v57 }
 0x214   : > { %v1874_v7 = vpop.permute.xlu0 %1873 }
 0x215   : > { %v1891_v13 = vmul.f32 %v1874_v7, %v4226_v34  ;;  %2957 = vmatprep.subr.bf16.mxu1 %v1923_v43 }
 0x216   : > { %v1876_v5 = vpop.permute.xlu1 %1875 }
 0x217   : > { %v1907_v61 = vadd.f32 %v1891_v13, %v1843_v25  ;;  %v1892_v11 = vmul.f32 %v1876_v5, %v4239_v52 }
 0x218   : > { %2958 = vmatpush3.bf16.xpose.msra.mxu1 %v1923_v43  ;;  %v1766_v21 = vpop.permute.xlu0 %1765 }
 0x219   : > { %2357 = vst [vmem:[%s4027_s25 + $0x70] sm:$0xff] %v1907_v61  ;;  %v1908_v12 = vadd.f32 %v1892_v11, %v1844_v14  ;;  %v1797_v47 = vmul.f32 %v1766_v21, %v4010_v41 }
 0x21a   : > { %v1768_v9 = vpop.permute.xlu1 %1767 }
 0x21b   : > { %2358 = vst [vmem:[%s4027_s25 + $0x78] sm:$0xff] %v1908_v12  ;;  %v1798_v0 = vmul.f32 %v1768_v9, %v4032_v58  ;;  %v1924_v7 = vpack.c.bf16 %v1908_v12, %v1907_v61  ;;  %v1813_v43 = vadd.f32 %v1797_v47, %v1749_v53  ;;  %v1756_v9 = vmul.f32 %v3913_v31, %v4114_v50  ;;  %s2715_s25 = sshll.u32 %s3333_s15, 4 }
 0x21c   : > { %v1770_v25 = vpop.permute.xlu0 %1769  ;;  %s2406_s26 = sadd.s32 %s2716_s24, %s2715_s25  ;;  %s3348_s24 = smov [#allocation5]  }
 0x21d   : > { %v1814_v13 = vadd.f32 %v1798_v0, %v1750_v37  ;;  %v1799_v5 = vmul.f32 %v1770_v25, %v4046_v22  ;;  %2959 = vmatprep.subr.bf16.mxu1 %v1924_v7  ;;  %v1753_v22 = vmul.f32 %v3897_v62, %v4071_v55  ;;  %s2717_s16 = sshll.u32 %s2406_s26, 7  ;;  %s3239_s26 = sshll.u32 %s3348_s24, 4  ;;  %s3240_s26 = int_to_ptr.vmem [resolvable:$false] %s3239_s26 }
 0x21e   : > { %v1772_v41 = vpop.permute.xlu1 %1771  ;;  %s4457_s20 = scalar_lea.hbm %s4545_s22, %s2717_s16  ;;  %s3241_s16 = scalar_lea.vmem %s3240_s26, 4096 }
 0x21f   : > { %v1800_v40 = vmul.f32 %v1772_v41, %v4062_v56  ;;  %v1909_v39 = vpack.c.bf16 %v1814_v13, %v1813_v43  ;;  %v1815_v58 = vadd.f32 %v1799_v5, %v1751_v15  ;;  %v1760_v43 = vmul.f32 %v3937_v19, %v4174_v63 }
 0x220   : > { %2960 = vmatpush3.bf16.xpose.msra.mxu1 %v1924_v7  ;;  %v1774_v57 = vpop.permute.xlu0 %1773 }
 0x221   : > { %v1816_v14 = vadd.f32 %v1800_v40, %v1752_v36  ;;  %v1801_v61 = vmul.f32 %v1774_v57, %v4076_v18  ;;  %2961 = vmatprep.mubr.bf16.mxu1 %v1909_v39  ;;  %v1755_v18 = vmul.f32 %v3909_v26, %v4101_v24  ;;  %v1758_v26 = vmul.f32 %v3925_v49, %v4144_v33 }
 0x222   : > { %v1776_v11 = vpop.permute.xlu1 %1775  ;;  %v1764_v40 = vmul.f32 %v3961_v45, %v4234_v35 }
 0x223   : > { %v1910_v20 = vpack.c.bf16 %v1816_v14, %v1815_v58  ;;  %v1802_v51 = vmul.f32 %v1776_v11, %v4088_v16  ;;  %v1817_v56 = vadd.f32 %v1801_v61, %v1753_v22 }
 0x224   : > { %v1778_v46 = vpop.permute.xlu0 %1777 }
 0x225   : > { %v1818_v21 = vadd.f32 %v1802_v51, %v1754_v48  ;;  %v1803_v12 = vmul.f32 %v1778_v46, %v4106_v30  ;;  %v1757_v30 = vmul.f32 %v3921_v44, %v4131_v29 }
 0x226   : > { %v1780_v47 = vpop.permute.xlu1 %1779 }
 0x227   : > { %v1804_v62 = vmul.f32 %v1780_v47, %v4119_v60  ;;  %2962 = vmatmul.mubr.bf16.vlgmr.msra.gmra.mrb[32].mxu1 %v1910_v20  ;;  %v1911_v55 = vpack.c.bf16 %v1818_v21, %v1817_v56  ;;  %v1819_v27 = vadd.f32 %v1803_v12, %v1755_v18 }
 0x228   : > { %v1782_v3 = vpop.permute.xlu0 %1781 }
 0x229   : > { %v1820_v53 = vadd.f32 %v1804_v62, %v1756_v9  ;;  %v1805_v16 = vmul.f32 %v1782_v3, %v4136_v42  ;;  %2965 = vmatprep.mubr.bf16.mxu1 %v1911_v55  ;;  %v1759_v42 = vmul.f32 %v3933_v2, %v4161_v6  ;;  %v1762_v2 = vmul.f32 %v3949_v32, %v4204_v4 }
 0x22a   : > { %v1784_v37 = vpop.permute.xlu1 %1783 }
 0x22b   : > { %v1806_v24 = vmul.f32 %v1784_v37, %v4149_v59  ;;  %v1912_v31 = vpack.c.bf16 %v1820_v53, %v1819_v27  ;;  %v1821_v60 = vadd.f32 %v1805_v16, %v1757_v30 }
 0x22c   : > { %v1786_v50 = vpop.permute.xlu0 %1785 }
 0x22d   : > { %v1822_v0 = vadd.f32 %v1806_v24, %v1758_v26  ;;  %v1807_v7 = vmul.f32 %v1786_v50, %v4166_v54  ;;  %v1761_v54 = vmul.f32 %v3945_v23, %v4191_v8 }
 0x22e   : > { %v1788_v25 = vpop.permute.xlu1 %1787 }
 0x22f   : > { %v1808_v44 = vmul.f32 %v1788_v25, %v4179_v1  ;;  %2966 = vmatmul.mubr.bf16.gmra.mrb[36].mxu1 %v1912_v31  ;;  %v1913_v29 = vpack.c.bf16 %v1822_v0, %v1821_v60  ;;  %v1823_v33 = vadd.f32 %v1807_v7, %v1759_v42 }
 0x230   : > { %v1790_v49 = vpop.permute.xlu0 %1789 }
 0x231   : > { %v1824_v59 = vadd.f32 %v1808_v44, %v1760_v43  ;;  %v1809_v13 = vmul.f32 %v1790_v49, %v4196_v17  ;;  %2969 = vmatprep.mubr.bf16.mxu1 %v1913_v29  ;;  %v1763_v17 = vmul.f32 %v3957_v38, %v4221_v10 }
 0x232   : > { %v1792_v5 = vpop.permute.xlu1 %1791 }
 0x233   : > { %v1810_v6 = vmul.f32 %v1792_v5, %v4209_v28  ;;  %v1914_v19 = vpack.c.bf16 %v1824_v59, %v1823_v33  ;;  %v1825_v1 = vadd.f32 %v1809_v13, %v1761_v54  ;;  %v2038_v33 = vld [vmem:[%s4530_s6] sm:$0xff]  ;;  %v2039_v54 = vld [vmem:[%s4530_s6 + $0x8] sm:$0xff] }
 0x234   : > { %v1794_v63 = vpop.permute.xlu0 %1793 }
 0x235   : > { %v1826_v41 = vadd.f32 %v1810_v6, %v1762_v2  ;;  %v1811_v15 = vmul.f32 %v1794_v63, %v4226_v34  ;;  %v2040_v63 = vld [vmem:[%s4530_s6 + $0x10] sm:$0xff] }
 0x236   : > { %v1796_v36 = vpop.permute.xlu1 %1795 }
 0x237   : > { %v1812_v23 = vmul.f32 %v1796_v36, %v4239_v52  ;;  %2970 = vmatmul.mubr.bf16.gmra.mrb[40].mxu1 %v1914_v19  ;;  %v1915_v32 = vpack.c.bf16 %v1826_v41, %v1825_v1  ;;  %v1827_v8 = vadd.f32 %v1811_v15, %v1763_v17 }
 0x239   : > { %v1828_v4 = vadd.f32 %v1812_v23, %v1764_v40  ;;  %2973 = vmatprep.mubr.bf16.mxu1 %v1915_v32  ;;  %v2041_v40 = vld [vmem:[%s4530_s6 + $0x18] sm:$0xff]  ;;  %v2042_v23 = vld [vmem:[%s4530_s6 + $0x20] sm:$0xff] }
 0x23b   : > { %v1916_v28 = vpack.c.bf16 %v1828_v4, %v1827_v8 }
 0x23f   : > { %2974 = vmatmul.mubr.bf16.gmra.mrb[44].mxu1 %v1916_v28 }
 0x293   : > { %v2865_v39 = vpop.f32.mrb[32].mxu0 }
 0x294   : > { %v2866_v38 = vpop.f32.mrb[33].mxu0 }
 0x295   : > { %v2867_v45 = vadd.f32 %v2866_v38, %v2865_v39  ;;  %v2868_v10 = vpop.f32.mrb[34].mxu0 }
 0x296   : > { %v2869_v34 = vpop.f32.mrb[35].mxu0 }
 0x297   : > { %2359 = vst [vmem:[%s4303_s12] sm:$0xff] %v2867_v45  ;;  %v2870_v35 = vadd.f32 %v2869_v34, %v2868_v10  ;;  %v2044_v10 = vld [vmem:[%s4530_s6 + $0x30] sm:$0xff]  ;;  %v2043_v34 = vld [vmem:[%s4530_s6 + $0x28] sm:$0xff] }
 0x299   : > { %v2190_v52 = vpack.c.bf16 %v2870_v35, %v2867_v45  ;;  %2360 = vst [vmem:[%s4303_s12 + $0x8] sm:$0xff] %v2870_v35 }
 0x29b   : > { %v2871_v57 = vpop.f32.mrb[36].mxu0  ;;  %2977 = vmatprep.subr.bf16.mxu1 %v2190_v52 }
 0x29c   : > { %v2872_v58 = vpop.f32.mrb[37].mxu0  ;;  %2978 = vmatpush3.bf16.msra.mxu1 %v2190_v52 }
 0x29d   : > { %v2873_v14 = vadd.f32 %v2872_v58, %v2871_v57  ;;  %v2874_v61 = vpop.f32.mrb[38].mxu0 }
 0x29e   : > { %v2875_v11 = vpop.f32.mrb[39].mxu0 }
 0x29f   : > { %2361 = vst [vmem:[%s4303_s12 + $0x10] sm:$0xff] %v2873_v14  ;;  %v2876_v22 = vadd.f32 %v2875_v11, %v2874_v61  ;;  %v2045_v61 = vld [vmem:[%s4530_s6 + $0x38] sm:$0xff]  ;;  %v2046_v11 = vld [vmem:[%s4530_s6 + $0x40] sm:$0xff] }
 0x2a1   : > { %v2191_v48 = vpack.c.bf16 %v2876_v22, %v2873_v14  ;;  %2362 = vst [vmem:[%s4303_s12 + $0x18] sm:$0xff] %v2876_v22 }
 0x2a3   : > { %v2877_v20 = vpop.f32.mrb[40].mxu0  ;;  %2979 = vmatprep.subr.bf16.mxu1 %v2191_v48 }
 0x2a4   : > { %v2878_v51 = vpop.f32.mrb[41].mxu0  ;;  %2980 = vmatpush3.bf16.msra.mxu1 %v2191_v48 }
 0x2a5   : > { %v2879_v46 = vadd.f32 %v2878_v51, %v2877_v20  ;;  %v2880_v56 = vpop.f32.mrb[42].mxu0 }
 0x2a6   : > { %v2881_v21 = vpop.f32.mrb[43].mxu0 }
 0x2a7   : > { %2363 = vst [vmem:[%s4303_s12 + $0x20] sm:$0xff] %v2879_v46  ;;  %v2882_v12 = vadd.f32 %v2881_v21, %v2880_v56 }
 0x2a9   : > { %v2192_v47 = vpack.c.bf16 %v2882_v12, %v2879_v46  ;;  %2364 = vst [vmem:[%s4303_s12 + $0x28] sm:$0xff] %v2882_v12  ;;  %v2048_v12 = vld [vmem:[%s4530_s6 + $0x50] sm:$0xff] }
 0x2ab   : > { %v2883_v18 = vpop.f32.mrb[44].mxu0  ;;  %2981 = vmatprep.subr.bf16.mxu1 %v2192_v47 }
 0x2ac   : > { %v2884_v9 = vpop.f32.mrb[45].mxu0  ;;  %2982 = vmatpush3.bf16.msra.mxu1 %v2192_v47  ;;  %v2047_v47 = vld [vmem:[%s4530_s6 + $0x48] sm:$0xff] }
 0x2ad   : > { %v2885_v62 = vadd.f32 %v2884_v9, %v2883_v18  ;;  %v2886_v55 = vpop.f32.mrb[46].mxu0 }
 0x2ae   : > { %v2887_v3 = vpop.f32.mrb[47].mxu0 }
 0x2af   : > { %2365 = vst [vmem:[%s4303_s12 + $0x30] sm:$0xff] %v2885_v62  ;;  %v2888_v27 = vadd.f32 %v2887_v3, %v2886_v55 }
 0x2b1   : > { %v2193_v53 = vpack.c.bf16 %v2888_v27, %v2885_v62  ;;  %2366 = vst [vmem:[%s4303_s12 + $0x38] sm:$0xff] %v2888_v27 }
 0x2b3   : > { %v2889_v16 = vpop.f32.mrb[48].mxu0  ;;  %2983 = vmatprep.subr.bf16.mxu1 %v2193_v53 }
 0x2b4   : > { %v2890_v37 = vpop.f32.mrb[49].mxu0  ;;  %2984 = vmatpush3.bf16.msra.mxu1 %v2193_v53 }
 0x2b5   : > { %v2891_v30 = vadd.f32 %v2890_v37, %v2889_v16  ;;  %v2892_v26 = vpop.f32.mrb[50].mxu0 }
 0x2b6   : > { %v2893_v24 = vpop.f32.mrb[51].mxu0 }
 0x2b7   : > { %2367 = vst [vmem:[%s4303_s12 + $0x40] sm:$0xff] %v2891_v30  ;;  %v2894_v31 = vadd.f32 %v2893_v24, %v2892_v26  ;;  %v2050_v26 = vld [vmem:[%s4530_s6 + $0x60] sm:$0xff] }
 0x2b9   : > { %v2194_v50 = vpack.c.bf16 %v2894_v31, %v2891_v30  ;;  %2368 = vst [vmem:[%s4303_s12 + $0x48] sm:$0xff] %v2894_v31  ;;  %v2049_v30 = vld [vmem:[%s4530_s6 + $0x58] sm:$0xff] }
 0x2bb   : > { %v2895_v60 = vpop.f32.mrb[52].mxu0  ;;  %2985 = vmatprep.subr.bf16.mxu1 %v2194_v50 }
 0x2bc   : > { %v2896_v0 = vpop.f32.mrb[53].mxu0  ;;  %2986 = vmatpush3.bf16.msra.mxu1 %v2194_v50 }
 0x2bd   : > { %v2897_v7 = vadd.f32 %v2896_v0, %v2895_v60  ;;  %v2898_v25 = vpop.f32.mrb[54].mxu0 }
 0x2be   : > { %v2899_v42 = vpop.f32.mrb[55].mxu0 }
 0x2bf   : > { %2369 = vst [vmem:[%s4303_s12 + $0x50] sm:$0xff] %v2897_v7  ;;  %v2900_v43 = vadd.f32 %v2899_v42, %v2898_v25 }
 0x2c1   : > { %v2195_v44 = vpack.c.bf16 %v2900_v43, %v2897_v7  ;;  %2370 = vst [vmem:[%s4303_s12 + $0x58] sm:$0xff] %v2900_v43 }
 0x2c3   : > { %2987 = vmatprep.subr.bf16.mxu1 %v2195_v44  ;;  %v2901_v18 = vpop.f32.mrb[56].mxu0 }
 0x2c4   : > { %2988 = vmatpush3.bf16.msra.mxu1 %v2195_v44  ;;  %v2902_v9 = vpop.f32.mrb[57].mxu0 }
 0x2c5   : > { %v2904_v62 = vpop.f32.mrb[58].mxu0  ;;  %v2903_v24 = vadd.f32 %v2902_v9, %v2901_v18 }
 0x2c6   : > { %v2905_v16 = vpop.f32.mrb[59].mxu0 }
 0x2c7   : > { %v2906_v31 = vadd.f32 %v2905_v16, %v2904_v62  ;;  %2371 = vst [vmem:[%s4303_s12 + $0x60] sm:$0xff] %v2903_v24 }
 0x2c9   : > { %v2196_v7 = vpack.c.bf16 %v2906_v31, %v2903_v24  ;;  %2372 = vst [vmem:[%s4303_s12 + $0x68] sm:$0xff] %v2906_v31 }
 0x2cb   : > { %2989 = vmatprep.subr.bf16.mxu1 %v2196_v7 }
 0x2cc   : > { %2990 = vmatpush3.bf16.msra.mxu1 %v2196_v7 }
 0x2fa   : > { %v2963_v29 = vpop.f32.mrb[32].mxu1 }
 0x2fb   : > { %v1959_v49 = vpop.f32.mrb[33].mxu1  ;;  %v2024_v2 = vmul.f32 0.088388346, %v2963_v29  ;;  %v2052_v29 = vld [vmem:[%s4530_s6 + $0x70] sm:$0xff] }
 0x2fc   : > { %v2022_v59 = vmul.f32 0.088388346, %v1959_v49  ;;  %v2964_v13 = vpop.f32.mrb[34].mxu1  ;;  %v2051_v49 = vld [vmem:[%s4530_s6 + $0x68] sm:$0xff] }
 0x2fd   : > { %v1962_v5 = vpop.f32.mrb[35].mxu1  ;;  %v2025_v41 = vmul.f32 0.088388346, %v2964_v13  ;;  %v4332_v36 = vadd.f32 %v2040_v63, %v2024_v2 }
 0x2fe   : > { %v2023_v6 = vmul.f32 0.088388346, %v1962_v5  ;;  %v4323_v19 = vadd.f32 %v2038_v33, %v2022_v59  ;;  %v2907_v33 = vpop.f32.mrb[60].mxu0 }
 0x2ff   : > { %v4341_v38 = vadd.f32 %v2041_v40, %v2025_v41  ;;  %v2908_v59 = vpop.f32.mrb[61].mxu0 }
 0x300   : > { %2070 = vmax.xlane.f32.xlu0 %v4323_v19  ;;  %v4329_v1 = vadd.f32 %v2039_v54, %v2023_v6  ;;  %v2910_v2 = vpop.f32.mrb[62].mxu0  ;;  %v2053_v6 = vld [vmem:[%s4530_s6 + $0x78] sm:$0xff]  ;;  %v2909_v63 = vadd.f32 %v2908_v59, %v2907_v33 }
 0x301   : > { %v2911_v41 = vpop.f32.mrb[63].mxu0 }
 0x302   : > { %2072 = vmax.xlane.f32.xlu1 %v4329_v1  ;;  %v2967_v15 = vpop.f32.mrb[36].mxu1  ;;  %2373 = vst [vmem:[%s4303_s12 + $0x70] sm:$0xff] %v2909_v63 }
 0x303   : > { %v1975_v17 = vpop.f32.mrb[37].mxu1  ;;  %v2028_v28 = vmul.f32 0.088388346, %v2967_v15  ;;  %v2912_v15 = vadd.f32 %v2911_v41, %v2910_v2 }
 0x304   : > { %v2026_v32 = vmul.f32 0.088388346, %v1975_v17  ;;  %2074 = vmax.xlane.f32.xlu0 %v4332_v36  ;;  %v2968_v8 = vpop.f32.mrb[38].mxu1 }
 0x305   : > { %v1978_v4 = vpop.f32.mrb[39].mxu1  ;;  %v2029_v35 = vmul.f32 0.088388346, %v2968_v8  ;;  %v4353_v57 = vadd.f32 %v2044_v10, %v2028_v28  ;;  %v2197_v40 = vpack.c.bf16 %v2912_v15, %v2909_v63  ;;  %2374 = vst [vmem:[%s4303_s12 + $0x78] sm:$0xff] %v2912_v15  ;;  %s897_s12 = sand.u32 1, %s3313_s10  }
 0x306   : > { %v2027_v39 = vmul.f32 0.088388346, %v1978_v4  ;;  %v4343_v45 = vadd.f32 %v2042_v23, %v2026_v32  ;;  %s2641_s28 = sshll.u32 %s897_s12, 7 }
 0x307   : > { %v4365_v56 = vadd.f32 %v2045_v61, %v2029_v35  ;;  %2991 = vmatprep.subr.bf16.mxu1 %v2197_v40  ;;  %s4436_s29 = scalar_lea.vmem [#allocation5], %s2641_s28  ;;  %s4466_s28 = scalar_lea.sflag [#allocation6], %s897_s12 }
 0x308   : > { %2076 = vmax.xlane.f32.xlu0 %v4341_v38  ;;  %2078 = vmax.xlane.f32.xlu1 %v4343_v45  ;;  %v4355_v58 = vadd.f32 %v2043_v34, %v2027_v39  ;;  %s2409_s23 = sshll.u32 %s4436_s29, 4  ;;  %s4459_s23 = int_to_ptr.vmem [resolvable:$true] %s2409_s23 }
 0x309   : > { %2992 = vmatpush3.bf16.msra.mxu1 %v2197_v40  ;;  %s3235_s25 = scalar_lea.vmem %s4459_s23, 2048  ;;  %p3242_p9 = scmp.lt.s32.totalorder %s4459_s23, %s3240_s26 }
 0x30a   : > { %v2971_v52 = vpop.f32.mrb[40].mxu1  ;;  %p3236_p5 = scmp.ne.s32.totalorder %s4459_s23, %s3235_s25  ;;  %p3243_p10 = scmp.lt.s32.totalorder %s3241_s16, %s3235_s25 }
 0x30b   : > { %v1991_v14 = vpop.f32.mrb[41].mxu1  ;;  %v2032_v51 = vmul.f32 0.088388346, %v2971_v52 }
 0x30c   : > { %v2030_v22 = vmul.f32 0.088388346, %v1991_v14  ;;  %2082 = vmax.xlane.f32.xlu1 %v4353_v57  ;;  %2080 = vmax.xlane.f32.xlu0 %v4355_v58  ;;  %v2972_v48 = vpop.f32.mrb[42].mxu1  ;;  %p3237_p6 = pnand %p3236_p5, %p3473_p7  ;;  %p3244_p11 = por %p3243_p10, %p3242_p9 }
 0x30d   : > { %v1994_v20 = vpop.f32.mrb[43].mxu1  ;;  %v2033_v55 = vmul.f32 0.088388346, %v2972_v48  ;;  %v4377_v27 = vadd.f32 %v2048_v12, %v2032_v51 }
 0x30e   : > { %v2031_v46 = vmul.f32 0.088388346, %v1994_v20  ;;  %v4367_v21 = vadd.f32 %v2046_v11, %v2030_v22  ;;  %p3238_p8 = pneg %p3237_p6 }
 0x30f   : > { %v4391_v43 = vadd.f32 %v2049_v30, %v2033_v55 }
 0x310   : > { %2084 = vmax.xlane.f32.xlu0 %v4365_v56  ;;  %2086 = vmax.xlane.f32.xlu1 %v4367_v21  ;;  %v4379_v53 = vadd.f32 %v2047_v47, %v2031_v46  ;;  %p3245_p13 = pnand %p3244_p11, %p3238_p8 }
 0x312   : > { %v2975_v3 = vpop.f32.mrb[44].mxu1 }
 0x313   : > { %v2007_v37 = vpop.f32.mrb[45].mxu1  ;;  %v2036_v25 = vmul.f32 0.088388346, %v2975_v3 }
 0x314   : > { %v2034_v50 = vmul.f32 0.088388346, %v2007_v37  ;;  %2090 = vmax.xlane.f32.xlu1 %v4377_v27  ;;  %2088 = vmax.xlane.f32.xlu0 %v4379_v53  ;;  %v2976_v60 = vpop.f32.mrb[46].mxu1 }
 0x315   : > { %v2010_v0 = vpop.f32.mrb[47].mxu1  ;;  %v2037_v13 = vmul.f32 0.088388346, %v2976_v60  ;;  %v4403_v5 = vadd.f32 %v2052_v29, %v2036_v25 }
 0x316   : > { %v2035_v42 = vmul.f32 0.088388346, %v2010_v0  ;;  %v4393_v44 = vadd.f32 %v2050_v26, %v2034_v50 }
 0x317   : > { %v4413_v17 = vadd.f32 %v2053_v6, %v2037_v13 }
 0x318   : > { %2092 = vmax.xlane.f32.xlu0 %v4391_v43  ;;  %2094 = vmax.xlane.f32.xlu1 %v4393_v44  ;;  %v4405_v54 = vadd.f32 %v2051_v49, %v2035_v42 }
 0x31c   : > { %2098 = vmax.xlane.f32.xlu1 %v4403_v5  ;;  %2096 = vmax.xlane.f32.xlu0 %v4405_v54 }
 0x320   : > { %2100 = vmax.xlane.f32.xlu0 %v4413_v17 }
 0x38d   : > { %v2071_v23 = vpop.xlane.xlu0 %2070 }
 0x38e   : > { %v2102_v32 = vsub.f32 %v4323_v19, %v2071_v23 }
 0x38f   : > { %v2073_v8 = vpop.xlane.xlu1 %2072 }
 0x390   : > { %v2118_v4 = vmul.f32 1.442695, %v2102_v32  ;;  %v2103_v28 = vsub.f32 %v4329_v1, %v2073_v8 }
 0x391   : > { %v2075_v39 = vpop.xlane.xlu0 %2074 }
 0x392   : > { %v2120_v10 = vmul.f32 1.442695, %v2103_v28  ;;  %v2104_v34 = vsub.f32 %v4332_v36, %v2075_v39  ;;  %3171 = vpow2.f32 %v2118_v4 }
 0x394   : > { %3173 = vpow2.f32 %v2120_v10  ;;  %v2122_v35 = vmul.f32 1.442695, %v2104_v34 }
 0x395   : > { %v2077_v52 = vpop.xlane.xlu0 %2076  ;;  %v2079_v14 = vpop.xlane.xlu1 %2078 }
 0x396   : > { %3175 = vpow2.f32 %v2122_v35  ;;  %v2105_v61 = vsub.f32 %v4341_v38, %v2077_v52  ;;  %v2106_v11 = vsub.f32 %v4343_v45, %v2079_v14 }
 0x398   : > { %v2124_v22 = vmul.f32 1.442695, %v2105_v61  ;;  %v2126_v19 = vmul.f32 1.442695, %v2106_v11 }
 0x399   : > { %v2083_v48 = vpop.xlane.xlu1 %2082  ;;  %v2081_v20 = vpop.xlane.xlu0 %2080 }
 0x39a   : > { %3177 = vpow2.f32 %v2124_v22  ;;  %v2108_v1 = vsub.f32 %v4353_v57, %v2083_v48  ;;  %v2107_v51 = vsub.f32 %v4355_v58, %v2081_v20 }
 0x39b   : > { %3179 = vpow2.f32 %v2126_v19 }
 0x39c   : > { %v2130_v36 = vmul.f32 1.442695, %v2108_v1  ;;  %v2128_v46 = vmul.f32 1.442695, %v2107_v51  ;;  %v3172_v12 = vpop.eup %3171 }
 0x39d   : > { %v2085_v47 = vpop.xlane.xlu0 %2084  ;;  %v2087_v18 = vpop.xlane.xlu1 %2086 }
 0x39e   : > { %v3174_v9 = vpop.eup %3173  ;;  %3181 = vpow2.f32 %v2130_v36  ;;  %v2109_v38 = vsub.f32 %v4365_v56, %v2085_v47  ;;  %v2110_v45 = vsub.f32 %v4367_v21, %v2087_v18 }
 0x39f   : > { %3183 = vpow2.f32 %v2128_v46  ;;  %v2182_v62 = vpack.c.bf16 %v3174_v9, %v3172_v12 }
 0x3a0   : > { %v3176_v55 = vpop.eup %3175  ;;  %v2132_v3 = vmul.f32 1.442695, %v2109_v38  ;;  %v2134_v16 = vmul.f32 1.442695, %v2110_v45 }
 0x3a1   : > { %2993 = vmatprep.mubr.bf16.mxu1 %v2182_v62  ;;  %v2091_v57 = vpop.xlane.xlu1 %2090  ;;  %v2089_v58 = vpop.xlane.xlu0 %2088  ;;  %2154 = vadd.xlane.f32.xlu1 %v3176_v55 }
 0x3a2   : > { %3185 = vpow2.f32 %v2132_v3  ;;  %v2112_v37 = vsub.f32 %v4377_v27, %v2091_v57  ;;  %v2111_v30 = vsub.f32 %v4379_v53, %v2089_v58 }
 0x3a3   : > { %3187 = vpow2.f32 %v2134_v16 }
 0x3a4   : > { %v3178_v26 = vpop.eup %3177  ;;  %v2138_v24 = vmul.f32 1.442695, %v2112_v37  ;;  %v2136_v31 = vmul.f32 1.442695, %v2111_v30 }
 0x3a5   : > { %v2093_v56 = vpop.xlane.xlu0 %2092  ;;  %2150 = vadd.xlane.f32.xlu1 %v3172_v12  ;;  %v2095_v21 = vpop.xlane.xlu1 %2094  ;;  %2156 = vadd.xlane.f32.xlu0 %v3178_v26  ;;  %v2183_v50 = vpack.c.bf16 %v3178_v26, %v3176_v55 }
 0x3a6   : > { %3189 = vpow2.f32 %v2138_v24  ;;  %v2113_v60 = vsub.f32 %v4391_v43, %v2093_v56  ;;  %v2114_v0 = vsub.f32 %v4393_v44, %v2095_v21  ;;  %v3180_v7 = vpop.eup %3179 }
 0x3a7   : > { %3191 = vpow2.f32 %v2136_v31  ;;  %2994 = vmatmul.mubr.bf16.vlgmr.msra.gmra.mrb[48].mxu1 %v2183_v50 }
 0x3a8   : > { %v3182_v27 = vpop.eup %3181  ;;  %v2140_v25 = vmul.f32 1.442695, %v2113_v60  ;;  %v2142_v42 = vmul.f32 1.442695, %v2114_v0 }
 0x3a9   : > { %v3184_v53 = vpop.eup %3183  ;;  %2162 = vadd.xlane.f32.xlu1 %v3182_v27  ;;  %v2099_v29 = vpop.xlane.xlu1 %2098  ;;  %2152 = vadd.xlane.f32.xlu0 %v3174_v9 }
 0x3aa   : > { %v2097_v49 = vpop.xlane.xlu0 %2096  ;;  %3193 = vpow2.f32 %v2140_v25  ;;  %v2116_v33 = vsub.f32 %v4403_v5, %v2099_v29  ;;  %v2184_v13 = vpack.c.bf16 %v3184_v53, %v3180_v7 }
 0x3ab   : > { %v2115_v59 = vsub.f32 %v4405_v54, %v2097_v49  ;;  %3195 = vpow2.f32 %v2142_v42 }
 0x3ac   : > { %v3186_v43 = vpop.eup %3185  ;;  %2997 = vmatprep.mubr.bf16.mxu1 %v2184_v13  ;;  %v2146_v44 = vmul.f32 1.442695, %v2116_v33 }
 0x3ad   : > { %v2144_v2 = vmul.f32 1.442695, %v2115_v59  ;;  %2158 = vadd.xlane.f32.xlu1 %v3180_v7  ;;  %2164 = vadd.xlane.f32.xlu0 %v3186_v43  ;;  %v2185_v63 = vpack.c.bf16 %v3186_v43, %v3182_v27  ;;  %v3188_v15 = vpop.eup %3187 }
 0x3ae   : > { %v2101_v6 = vpop.xlane.xlu0 %2100 }
 0x3af   : > { %v2117_v41 = vsub.f32 %v4413_v17, %v2101_v6  ;;  %3197 = vpow2.f32 %v2144_v2  ;;  %2998 = vmatmul.mubr.bf16.gmra.mrb[52].mxu1 %v2185_v63 }
 0x3b0   : > { %v3190_v40 = vpop.eup %3189  ;;  %3199 = vpow2.f32 %v2146_v44 }
 0x3b1   : > { %v2148_v23 = vmul.f32 1.442695, %v2117_v41  ;;  %v3192_v5 = vpop.eup %3191  ;;  %2170 = vadd.xlane.f32.xlu1 %v3190_v40  ;;  %2160 = vadd.xlane.f32.xlu0 %v3184_v53 }
 0x3b2   : > { %v2186_v54 = vpack.c.bf16 %v3192_v5, %v3188_v15 }
 0x3b3   : > { %3201 = vpow2.f32 %v2148_v23 }
 0x3b4   : > { %v3194_v32 = vpop.eup %3193  ;;  %3001 = vmatprep.mubr.bf16.mxu1 %v2186_v54 }
 0x3b5   : > { %2166 = vadd.xlane.f32.xlu1 %v3188_v15  ;;  %2172 = vadd.xlane.f32.xlu0 %v3194_v32  ;;  %v2187_v8 = vpack.c.bf16 %v3194_v32, %v3190_v40  ;;  %v3196_v4 = vpop.eup %3195 }
 0x3b7   : > { %3002 = vmatmul.mubr.bf16.gmra.mrb[56].mxu1 %v2187_v8 }
 0x3b9   : > { %v3198_v28 = vpop.eup %3197  ;;  %2174 = vadd.xlane.f32.xlu1 %v3196_v4  ;;  %2168 = vadd.xlane.f32.xlu0 %v3192_v5 }
 0x3ba   : > { %v2188_v17 = vpack.c.bf16 %v3198_v28, %v3196_v4  ;;  %v3200_v39 = vpop.eup %3199 }
 0x3bc   : > { %3005 = vmatprep.mubr.bf16.mxu1 %v2188_v17 }
 0x3bd   : > { %v3202_v10 = vpop.eup %3201  ;;  %2178 = vadd.xlane.f32.xlu1 %v3200_v39  ;;  %2176 = vadd.xlane.f32.xlu0 %v3198_v28 }
 0x3be   : > { %v2189_v34 = vpack.c.bf16 %v3202_v10, %v3200_v39 }
 0x3c0   : > { %3006 = vmatmul.mubr.bf16.gmra.mrb[60].mxu1 %v2189_v34 }
 0x3c1   : > { %2180 = vadd.xlane.f32.xlu0 %v3202_v10 }
 0x42e   : > { %v2155_v35 = vpop.xlane.xlu1 %2154 }
 0x42f   : > { %3203 = vrcp.f32 %v2155_v35 }
 0x432   : > { %v2157_v52 = vpop.xlane.xlu0 %2156  ;;  %v2151_v14 = vpop.xlane.xlu1 %2150 }
 0x433   : > { %3205 = vrcp.f32 %v2151_v14 }
 0x434   : > { %3207 = vrcp.f32 %v2157_v52 }
 0x436   : > { %v2153_v61 = vpop.xlane.xlu0 %2152  ;;  %v2163_v11 = vpop.xlane.xlu1 %2162 }
 0x437   : > { %3209 = vrcp.f32 %v2153_v61 }
 0x438   : > { %3211 = vrcp.f32 %v2163_v11 }
 0x439   : > { %v3204_v36 = vpop.eup %3203 }
 0x43a   : > { %v2165_v22 = vpop.xlane.xlu0 %2164  ;;  %v2159_v19 = vpop.xlane.xlu1 %2158 }
 0x43b   : > { %3213 = vrcp.f32 %v2159_v19 }
 0x43c   : > { %3215 = vrcp.f32 %v2165_v22 }
 0x43d   : > { %v3206_v12 = vpop.eup %3205 }
 0x43e   : > { %v2161_v48 = vpop.xlane.xlu0 %2160  ;;  %v2171_v20 = vpop.xlane.xlu1 %2170 }
 0x43f   : > { %3217 = vrcp.f32 %v2161_v48  ;;  %v3208_v38 = vpop.eup %3207 }
 0x440   : > { %3219 = vrcp.f32 %v2171_v20 }
 0x441   : > { %v3210_v55 = vpop.eup %3209 }
 0x442   : > { %v2173_v1 = vpop.xlane.xlu0 %2172  ;;  %v2167_v51 = vpop.xlane.xlu1 %2166 }
 0x443   : > { %3221 = vrcp.f32 %v2167_v51  ;;  %v3212_v30 = vpop.eup %3211 }
 0x444   : > { %3223 = vrcp.f32 %v2173_v1 }
 0x445   : > { %v3214_v24 = vpop.eup %3213 }
 0x446   : > { %v2169_v47 = vpop.xlane.xlu0 %2168  ;;  %v2175_v58 = vpop.xlane.xlu1 %2174 }
 0x447   : > { %3225 = vrcp.f32 %v2169_v47  ;;  %v3216_v21 = vpop.eup %3215 }
 0x449   : > { %v3218_v0 = vpop.eup %3217 }
 0x44a   : > { %v2177_v37 = vpop.xlane.xlu0 %2176  ;;  %v2179_v7 = vpop.xlane.xlu1 %2178 }
 0x44b   : > { %3227 = vrcp.f32 %v2179_v7  ;;  %v3220_v29 = vpop.eup %3219 }
 0x44c   : > { %3229 = vrcp.f32 %v2175_v58 }
 0x44d   : > { %v3222_v33 = vpop.eup %3221 }
 0x44e   : > { %v2181_v42 = vpop.xlane.xlu0 %2180  ;;  %v3224_v43 = vpop.eup %3223 }
 0x44f   : > { %3231 = vrcp.f32 %v2181_v42 }
 0x450   : > { %3233 = vrcp.f32 %v2177_v37 }
 0x451   : > { %v3226_v6 = vpop.eup %3225 }
 0x455   : > { %v3228_v40 = vpop.eup %3227 }
 0x456   : > { %v3230_v5 = vpop.eup %3229 }
 0x459   : > { %v3232_v8 = vpop.eup %3231 }
 0x45a   : > { %v3234_v17 = vpop.eup %3233 }
 0x47a   : > { %v2995_v46 = vpop.f32.mrb[48].mxu1 }
 0x47b   : > { %v2300_v18 = vmul.f32 %v3204_v36, %v2995_v46  ;;  %v2232_v9 = vpop.f32.mrb[49].mxu1 }
 0x47c   : > { %v2296_v45 = vmul.f32 %v3206_v12, %v2232_v9  ;;  %v2996_v62 = vpop.f32.mrb[50].mxu1 }
 0x47d   : > { %2329 = vst [vmem:[%s4436_s29 + $0x10] sm:$0xff] %v2300_v18  ;;  %v2302_v3 = vmul.f32 %v3208_v38, %v2996_v62  ;;  %v2235_v16 = vpop.f32.mrb[51].mxu1 }
 0x47e   : > { %2327 = vst [vmem:[%s4436_s29] sm:$0xff] %v2296_v45  ;;  %v2298_v57 = vmul.f32 %v3210_v55, %v2235_v16 }
 0x47f   : > { %2330 = vst [vmem:[%s4436_s29 + $0x18] sm:$0xff] %v2302_v3 }
 0x480   : > { %2328 = vst [vmem:[%s4436_s29 + $0x8] sm:$0xff] %v2298_v57 }
 0x482   : > { %v2999_v26 = vpop.f32.mrb[52].mxu1 }
 0x483   : > { %v2308_v31 = vmul.f32 %v3212_v30, %v2999_v26  ;;  %v2248_v56 = vpop.f32.mrb[53].mxu1 }
 0x484   : > { %v2304_v50 = vmul.f32 %v3214_v24, %v2248_v56  ;;  %v3000_v60 = vpop.f32.mrb[54].mxu1 }
 0x485   : > { %2333 = vst [vmem:[%s4436_s29 + $0x30] sm:$0xff] %v2308_v31  ;;  %v2310_v27 = vmul.f32 %v3216_v21, %v3000_v60  ;;  %v2251_v25 = vpop.f32.mrb[55].mxu1 }
 0x486   : > { %2331 = vst [vmem:[%s4436_s29 + $0x20] sm:$0xff] %v2304_v50  ;;  %v2306_v53 = vmul.f32 %v3218_v0, %v2251_v25 }
 0x487   : > { %2334 = vst [vmem:[%s4436_s29 + $0x38] sm:$0xff] %v2310_v27 }
 0x488   : > { %2332 = vst [vmem:[%s4436_s29 + $0x28] sm:$0xff] %v2306_v53 }
 0x48a   : > { %v3003_v49 = vpop.f32.mrb[56].mxu1 }
 0x48b   : > { %v2316_v59 = vmul.f32 %v3220_v29, %v3003_v49  ;;  %v2264_v13 = vpop.f32.mrb[57].mxu1 }
 0x48c   : > { %v2312_v2 = vmul.f32 %v3222_v33, %v2264_v13  ;;  %v3004_v44 = vpop.f32.mrb[58].mxu1 }
 0x48d   : > { %2337 = vst [vmem:[%s4436_s29 + $0x50] sm:$0xff] %v2316_v59  ;;  %v2318_v63 = vmul.f32 %v3224_v43, %v3004_v44  ;;  %v2267_v41 = vpop.f32.mrb[59].mxu1 }
 0x48e   : > { %2335 = vst [vmem:[%s4436_s29 + $0x40] sm:$0xff] %v2312_v2  ;;  %v2314_v15 = vmul.f32 %v3226_v6, %v2267_v41 }
 0x48f   : > { %2338 = vst [vmem:[%s4436_s29 + $0x58] sm:$0xff] %v2318_v63 }
 0x490   : > { %2336 = vst [vmem:[%s4436_s29 + $0x48] sm:$0xff] %v2314_v15 }
 0x493   : > { %v3007_v23 = vpop.f32.mrb[60].mxu1 }
 0x494   : > { %v2324_v54 = vmul.f32 %v3228_v40, %v3007_v23  ;;  %v2280_v32 = vpop.f32.mrb[61].mxu1 }
 0x495   : > { %v2320_v4 = vmul.f32 %v3230_v5, %v2280_v32  ;;  %v3008_v28 = vpop.f32.mrb[62].mxu1 }
 0x496   : > { %2341 = vst [vmem:[%s4436_s29 + $0x70] sm:$0xff] %v2324_v54  ;;  %v2326_v39 = vmul.f32 %v3232_v8, %v3008_v28  ;;  %v2283_v10 = vpop.f32.mrb[63].mxu1 }
 0x497   : > { %2339 = vst [vmem:[%s4436_s29 + $0x60] sm:$0xff] %v2320_v4  ;;  %v2322_v34 = vmul.f32 %v3234_v17, %v2283_v10 }
 0x498   : > { %2342 = vst [vmem:[%s4436_s29 + $0x78] sm:$0xff] %v2326_v39 }
 0x499   : > { %2340 = vst [vmem:[%s4436_s29 + $0x68] sm:$0xff] %v2322_v34 }
 0x49a   : > { %3248 = shalt.err (!%p3245_p13)
}
 0x49b   : > { %s3249_s12 = scalar_lea.hbm %s4457_s20, 2048  ;;  %s3253_s15 = scalar_lea.hbm %s4545_s22, 8192 }
 0x49c   : > { %p3250_p0 = scmp.ne.s32.totalorder %s4457_s20, %s3249_s12  ;;  %p3254_p3 = scmp.lt.u32.totalorder %s4457_s20, %s4545_s22 }
 0x49d   : > { %p3255_p4 = scmp.lt.u32.totalorder %s3253_s15, %s3249_s12  ;;  %p3257_p6 = scmp.lt.u32.totalorder %s3249_s12, %s4457_s20 }
 0x49e   : > { %p3251_p1 = pnand %p3250_p0, %p3473_p7 }
 0x49f   : > { %p3256_p5 = por %p3255_p4, %p3254_p3 }
 0x4a0   : > { %p3252_p2 = pneg %p3251_p1 }
 0x4a1   : > { %p3258_p8 = por %p3257_p6, %p3256_p5 }
 0x4a3   : > { %p3259_p9 = pnand %p3258_p8, %p3252_p2 }
 0x4a5   : > { %3262 = shalt.err (!%p3259_p9)
}
 0x4a6   : > { %s3349_s25 = smov 128   ;;  %s3350_s16 = smov 8  }
 0x4a7   : > { %3009 = dma.vmem_to_hbm [thread:$0]  (%p3473_p7), %s4459_s23, 2048, %s4457_s20, %s4466_s28, %s3349_s25, %s3349_s25, %s3350_s16  }
 0x4a8 PF: > { %p3015_p10 = scmp.ge.s32.totalorder %s3345_s18, 2  ;;  %s2430_s29 = sand.u32 1, %s3309_s30  }
 0x4a9   : > { %s2431_s12 = scalar_lea.sflag [#allocation6], %s2430_s29 }
 0x4aa   : > { %p3012_p11 = pnand %p3015_p10, %p3481_p12 }
 0x4ac   : > { %3304 = dma.done.wait (!%p3012_p11), %s2431_s12, 2048  }
 0x4ad   : > { %3306 = vsyncadd (!%p3012_p11), %s2431_s12, 4294965248  ;;  %s23_s18 = sadd.s32 1, %s3345_s18   ;;  %s4546_s14 = sld [smem:[#allocation8_spill]] }
 0x4ae   : > { %p20_p13 = scmp.ge.s32.totalorder %s23_s18, 6   ;;  %s4547_s16 = sld [smem:[#allocation9_spill]] }
 0x4af   : > { %s4548_s27 = sld [smem:[#allocation10_spill]]  ;;  %s4549_s30 = smov %s3313_s10 }
 0x4b0   : > { %s4550_s10 = smov %s3317_s11  ;;  %s4551_s11 = smov %s3489_s19 }
 0x4b1   : > { %s4552_s12 = smov %s3325_s13  ;;  %s4553_s13 = smov %s3486_s21 }
 0x4b2   : > { %s4554_s15 = smov %s3341_s17  ;;  %22 = sbr.rel (!%p20_p13) target bundleno = 8 (0x8), region = 254 }
 0x4b5   : > { %s4555_s17 = smov %s4548_s27 }
 0x4b9   :  { %2460 = vsyncpa [#allocation6], 1 }
 0x4ba   :  { %2462 = vsyncpa [#allocation6 + $0x1], 1 }

// kernel: self_attention_forward.3
= control target key start
LH: loop header
LB: loop body
LE: loop exit
PB: predicated region body
PF: predicated region fallthrough
CT: control target
= control target key end

     0   :  { %7 = vsyncpa [#allocation3], 0  ;;  %s1205_s0 = inlined_call_operand.vmem [shape: bf16[256,256], index: 0, kind: input, shape index: {}]   ;;  %s1206_s1 = inlined_call_operand.vmem [shape: bf16[256,256], index: 1, kind: input, shape index: {}]   ;;  %s1207_s2 = inlined_call_operand.hbm [shape: f32[256,256], index: 2, kind: output, shape index: {}]  }
   0x1   :  { %9 = vsyncpa [#allocation3 + $0x1], 0  ;;  %s950_s9 = smov 0   ;;  %s952_s10 = smov 0  }
   0x2   :  { %s954_s11 = smov 0   ;;  %s956_s12 = smov 0  }
   0x3 LB: > { %s971_s13 = sadd.s32 4294967295, %s930_s12   ;;  %s658_s14 = sadd.s32 4294967294, %s930_s12   ;;  %s930_s12 = sphi %s956_s12, %s1213_s12   ;;  %s926_s11 = sphi %s954_s11, %s1212_s11   ;;  %s922_s10 = sphi %s952_s10, %s1211_s10   ;;  %s918_s9 = sphi %s950_s9, %s1210_s9  }
   0x4   : > { %s975_s15 = sadd.s32 1, %s930_s12   ;;  %s69_s16 = sadd.s32 1, %s926_s11 }
   0x5   : > { %s66_s17 = ssub.s32 %s930_s12, %s975_s15  ;;  %p79_p0 = scmp.ne.s32.totalorder %s926_s11, %s922_s10 }
   0x6   : > { %p67_p1 = scmp.eq.s32.totalorder %s66_s17, 0  ;;  %p80_p2 = scmp.eq.s32.totalorder %s971_s13, 1 }
   0x7   : > { %p85_p3 = scmp.ne.s32.totalorder %s922_s10, %s918_s9  ;;  %p86_p4 = scmp.eq.s32.totalorder %s658_s14, 1 }
   0x8   : > { %s986_s18 = scalar_select %p67_p1, %s926_s11, %s69_s16  }
   0x9   : > { %p988_p5 = por %p80_p2, %p79_p0  ;;  %p992_p6 = por %p86_p4, %p85_p3 }
   0xa   : > { %p661_p7 = scmp.ge.s32.totalorder %s930_s12, 1  ;;  %p117_p8 = scmp.lt.s32.totalorder %s930_s12, 3 }
   0xc   : > { %p118_p9 = pnand %p661_p7, %p117_p8 }
   0xd   : > { %v796_v0 = vld [vmem:[%s1206_s1 + $0x4] ss:$8 sps:$4 sm:$0xff] (!%p118_p9)   ;;  %v798_v1 = vld [vmem:[%s1206_s1] ss:$8 sps:$4 sm:$0xff] (!%p118_p9)   ;;  %v799_v2 = vld [vmem:[%s1206_s1 + $0x14] ss:$8 sps:$4 sm:$0xff] (!%p118_p9)  }
   0xe   : > { %121 = sbr.rel (%p118_p9) target bundleno = 332 (0x14c), region = 28  ;;  %436 = vmatprep.subr.bf16.mxu0 (!%p118_p9), %v796_v0  ;;  %723 = vmatprep.subr.bf16.mxu1 (!%p118_p9), %v796_v0  ;;  %v801_v3 = vld [vmem:[%s1206_s1 + $0x10] ss:$8 sps:$4 sm:$0xff] (!%p118_p9)   ;;  %v802_v4 = vld [vmem:[%s1206_s1 + $0x24] ss:$8 sps:$4 sm:$0xff] (!%p118_p9)   ;;  %s663_s3 = sshll.u32 (!%p118_p9), %s971_s13, 4 }
   0xf   : > { %437 = vmatpush1.bf16.msra.mxu0 (!%p118_p9), %v798_v1  ;;  %739 = vmatpush1.bf16.msra.mxu1 (!%p118_p9), %v798_v1  ;;  %v804_v5 = vld [vmem:[%s1206_s1 + $0x20] ss:$8 sps:$4 sm:$0xff] (!%p118_p9)   ;;  %v805_v6 = vld [vmem:[%s1206_s1 + $0x34] ss:$8 sps:$4 sm:$0xff] (!%p118_p9)   ;;  %p141_p10 = scmp.lt.s32.totalorder (!%p118_p9), %s663_s3, 31  ;;  %s137_s7 = sand.u32 (!%p118_p9), 1, %s922_s10  }
  0x10   : > { %438 = vmatprep.subr.bf16.mxu0 (!%p118_p9), %v799_v2  ;;  %724 = vmatprep.subr.bf16.mxu1 (!%p118_p9), %v799_v2  ;;  %v807_v7 = vld [vmem:[%s1206_s1 + $0x30] ss:$8 sps:$4 sm:$0xff] (!%p118_p9)   ;;  %v808_v8 = vld [vmem:[%s1206_s1 + $0x44] ss:$8 sps:$4 sm:$0xff] (!%p118_p9)   ;;  %v810_v9 = vld [vmem:[%s1206_s1 + $0x40] ss:$8 sps:$4 sm:$0xff] (!%p118_p9)  }
  0x11   : > { %v811_v10 = vld [vmem:[%s1206_s1 + $0x54] ss:$8 sps:$4 sm:$0xff] (!%p118_p9)   ;;  %v813_v11 = vld [vmem:[%s1206_s1 + $0x50] ss:$8 sps:$4 sm:$0xff] (!%p118_p9)   ;;  %v814_v12 = vld [vmem:[%s1206_s1 + $0x64] ss:$8 sps:$4 sm:$0xff] (!%p118_p9)  }
  0x12   : > { %v816_v14 = vld [vmem:[%s1206_s1 + $0x60] ss:$8 sps:$4 sm:$0xff] (!%p118_p9)   ;;  %v817_v16 = vld [vmem:[%s1206_s1 + $0x74] ss:$8 sps:$4 sm:$0xff] (!%p118_p9)   ;;  %v819_v17 = vld [vmem:[%s1206_s1 + $0x70] ss:$8 sps:$4 sm:$0xff] (!%p118_p9)  }
  0x13   : > { %439 = vmatpush1.bf16.msra.mxu0 (!%p118_p9), %v801_v3  ;;  %740 = vmatpush1.bf16.msra.mxu1 (!%p118_p9), %v801_v3  ;;  %v820_v18 = vld [vmem:[%s1206_s1 + $0x84] ss:$8 sps:$4 sm:$0xff] (!%p118_p9)   ;;  %v822_v19 = vld [vmem:[%s1206_s1 + $0x80] ss:$8 sps:$4 sm:$0xff] (!%p118_p9)   ;;  %v823_v20 = vld [vmem:[%s1206_s1 + $0x94] ss:$8 sps:$4 sm:$0xff] (!%p118_p9)  }
  0x14   : > { %440 = vmatprep.subr.bf16.mxu0 (!%p118_p9), %v802_v4  ;;  %725 = vmatprep.subr.bf16.mxu1 (!%p118_p9), %v802_v4  ;;  %v825_v21 = vld [vmem:[%s1206_s1 + $0x90] ss:$8 sps:$4 sm:$0xff] (!%p118_p9)   ;;  %v826_v22 = vld [vmem:[%s1206_s1 + $0xa4] ss:$8 sps:$4 sm:$0xff] (!%p118_p9)   ;;  %v828_v23 = vld [vmem:[%s1206_s1 + $0xa0] ss:$8 sps:$4 sm:$0xff] (!%p118_p9)  }
  0x15   : > { %s1215_s3 = smov (!%p141_p10, %s663_s3), 31  ;;  %v829_v24 = vld [vmem:[%s1206_s1 + $0xb4] ss:$8 sps:$4 sm:$0xff]   ;;  %v831_v25 = vld [vmem:[%s1206_s1 + $0xb0] ss:$8 sps:$4 sm:$0xff]   ;;  %s662_s8 = sshll.u32 %s137_s7, 8 }
  0x16   : > { %s720_s25 = sshll.u32 %s1215_s3, 3  ;;  %v832_v26 = vld [vmem:[%s1206_s1 + $0xc4] ss:$8 sps:$4 sm:$0xff]   ;;  %v834_v27 = vld [vmem:[%s1206_s1 + $0xc0] ss:$8 sps:$4 sm:$0xff]   ;;  %s1119_s14 = scalar_lea.vmem [#allocation2], %s662_s8 }
  0x17   : > { %441 = vmatpush1.bf16.msra.mxu0 %v804_v5  ;;  %741 = vmatpush1.bf16.msra.mxu1 %v804_v5  ;;  %s1038_s30 = scalar_lea.vmem %s1205_s0, %s720_s25  ;;  %v835_v28 = vld [vmem:[%s1206_s1 + $0xd4] ss:$8 sps:$4 sm:$0xff]   ;;  %v837_v29 = vld [vmem:[%s1206_s1 + $0xd0] ss:$8 sps:$4 sm:$0xff]   ;;  %v838_v30 = vld [vmem:[%s1206_s1 + $0xe4] ss:$8 sps:$4 sm:$0xff]  }
  0x18   : > { %442 = vmatprep.subr.bf16.mxu0 %v805_v6  ;;  %726 = vmatprep.subr.bf16.mxu1 %v805_v6  ;;  %v846_v13 = vld [vmem:[%s1038_s30 + $0x4] ss:$8 sps:$4 sm:$0xff]   ;;  %v840_v31 = vld [vmem:[%s1206_s1 + $0xe0] ss:$8 sps:$4 sm:$0xff]   ;;  %v841_v32 = vld [vmem:[%s1206_s1 + $0xf4] ss:$8 sps:$4 sm:$0xff]  }
  0x19   : > { %v849_v15 = vld [vmem:[%s1038_s30 + $0x44] ss:$8 sps:$4 sm:$0xff]   ;;  %468 = vmatprep.mubr.bf16.mxu0 %v846_v13  ;;  %v843_v33 = vld [vmem:[%s1206_s1 + $0xf0] ss:$8 sps:$4 sm:$0xff]   ;;  %v844_v34 = vld [vmem:[%s1038_s30] ss:$8 sps:$4 sm:$0xff]  }
  0x1a   : > { %508 = vmatprep.mubr.bf16.mxu1 %v849_v15  ;;  %v847_v35 = vld [vmem:[%s1038_s30 + $0x40] ss:$8 sps:$4 sm:$0xff]   ;;  %v850_v36 = vld [vmem:[%s1038_s30 + $0x14] ss:$8 sps:$4 sm:$0xff]   ;;  %v854_v38 = vld [vmem:[%s1038_s30 + $0x10] ss:$8 sps:$4 sm:$0xff]  }
  0x1b   : > { %443 = vmatpush1.bf16.msra.mxu0 %v807_v7  ;;  %742 = vmatpush1.bf16.msra.mxu1 %v807_v7  ;;  %v852_v37 = vld [vmem:[%s1038_s30 + $0x54] ss:$8 sps:$4 sm:$0xff]   ;;  %v855_v39 = vld [vmem:[%s1038_s30 + $0x50] ss:$8 sps:$4 sm:$0xff]   ;;  %v856_v40 = vld [vmem:[%s1038_s30 + $0x24] ss:$8 sps:$4 sm:$0xff]  }
  0x1c   : > { %444 = vmatprep.subr.bf16.mxu0 %v808_v8  ;;  %727 = vmatprep.subr.bf16.mxu1 %v808_v8  ;;  %v858_v41 = vld [vmem:[%s1038_s30 + $0x64] ss:$8 sps:$4 sm:$0xff]   ;;  %v860_v42 = vld [vmem:[%s1038_s30 + $0x20] ss:$8 sps:$4 sm:$0xff]   ;;  %v862_v44 = vld [vmem:[%s1038_s30 + $0x34] ss:$8 sps:$4 sm:$0xff]  }
  0x1d   : > { %v861_v43 = vld [vmem:[%s1038_s30 + $0x60] ss:$8 sps:$4 sm:$0xff]   ;;  %v864_v45 = vld [vmem:[%s1038_s30 + $0x74] ss:$8 sps:$4 sm:$0xff]   ;;  %v866_v46 = vld [vmem:[%s1038_s30 + $0x30] ss:$8 sps:$4 sm:$0xff]  }
  0x1e   : > { %v867_v47 = vld [vmem:[%s1038_s30 + $0x70] ss:$8 sps:$4 sm:$0xff]   ;;  %s722_s30 = sshll.u32 %s971_s13, 12  ;;  %s596_s16 = sshll.u32 %s1119_s14, 4  ;;  %s1154_s16 = int_to_ptr.vmem [resolvable:$true] %s596_s16 }
  0x1f   : > { %445 = vmatpush1.bf16.msra.mxu0 %v810_v9  ;;  %743 = vmatpush1.bf16.msra.mxu1 %v810_v9  ;;  %s1152_s22 = scalar_lea.hbm %s1207_s2, %s722_s30  ;;  %s1164_s13 = scalar_lea.sflag [#allocation3], %s137_s7 }
  0x20   : > { %446 = vmatprep.subr.bf16.mxu0 %v811_v10  ;;  %728 = vmatprep.subr.bf16.mxu1 %v811_v10  ;;  %s868_s23 = scalar_lea.vmem %s1154_s16, 4096  ;;  %s932_s24 = smov [#allocation2]  }
  0x21   : > { %p869_p11 = scmp.ne.s32.totalorder %s1154_s16, %s868_s23  ;;  %s872_s25 = sshll.u32 %s932_s24, 4  ;;  %s873_s25 = int_to_ptr.vmem [resolvable:$false] %s872_s25 }
  0x22   : > { %s874_s26 = scalar_lea.vmem %s873_s25, 8192  ;;  %p875_p0 = scmp.lt.s32.totalorder %s1154_s16, %s873_s25 }
  0x23   : > { %447 = vmatpush1.bf16.msra.mxu0 %v813_v11  ;;  %744 = vmatpush1.bf16.msra.mxu1 %v813_v11  ;;  %p870_p12 = pnand %p869_p11, %p988_p5  ;;  %p876_p1 = scmp.lt.s32.totalorder %s874_s26, %s868_s23 }
  0x24   : > { %448 = vmatprep.subr.bf16.mxu0 %v814_v12  ;;  %729 = vmatprep.subr.bf16.mxu1 %v814_v12 }
  0x25   : > { %p871_p13 = pneg %p870_p12  ;;  %p877_p2 = por %p876_p1, %p875_p0 }
  0x27   : > { %449 = vmatpush1.bf16.msra.mxu0 %v816_v14  ;;  %745 = vmatpush1.bf16.msra.mxu1 %v816_v14  ;;  %p878_p3 = pnand %p877_p2, %p871_p13 }
  0x28   : > { %450 = vmatprep.subr.bf16.mxu0 %v817_v16  ;;  %730 = vmatprep.subr.bf16.mxu1 %v817_v16 }
  0x2b   : > { %451 = vmatpush1.bf16.msra.mxu0 %v819_v17  ;;  %746 = vmatpush1.bf16.msra.mxu1 %v819_v17 }
  0x2c   : > { %452 = vmatprep.subr.bf16.mxu0 %v820_v18  ;;  %731 = vmatprep.subr.bf16.mxu1 %v820_v18 }
  0x2f   : > { %453 = vmatpush1.bf16.msra.mxu0 %v822_v19  ;;  %747 = vmatpush1.bf16.msra.mxu1 %v822_v19 }
  0x30   : > { %454 = vmatprep.subr.bf16.mxu0 %v823_v20  ;;  %732 = vmatprep.subr.bf16.mxu1 %v823_v20 }
  0x33   : > { %455 = vmatpush1.bf16.msra.mxu0 %v825_v21  ;;  %748 = vmatpush1.bf16.msra.mxu1 %v825_v21 }
  0x34   : > { %456 = vmatprep.subr.bf16.mxu0 %v826_v22  ;;  %733 = vmatprep.subr.bf16.mxu1 %v826_v22 }
  0x37   : > { %457 = vmatpush1.bf16.msra.mxu0 %v828_v23  ;;  %749 = vmatpush1.bf16.msra.mxu1 %v828_v23 }
  0x38   : > { %458 = vmatprep.subr.bf16.mxu0 %v829_v24  ;;  %734 = vmatprep.subr.bf16.mxu1 %v829_v24 }
  0x3b   : > { %459 = vmatpush1.bf16.msra.mxu0 %v831_v25  ;;  %750 = vmatpush1.bf16.msra.mxu1 %v831_v25 }
  0x3c   : > { %460 = vmatprep.subr.bf16.mxu0 %v832_v26  ;;  %735 = vmatprep.subr.bf16.mxu1 %v832_v26 }
  0x3f   : > { %461 = vmatpush1.bf16.msra.mxu0 %v834_v27  ;;  %751 = vmatpush1.bf16.msra.mxu1 %v834_v27 }
  0x40   : > { %462 = vmatprep.subr.bf16.mxu0 %v835_v28  ;;  %736 = vmatprep.subr.bf16.mxu1 %v835_v28 }
  0x43   : > { %463 = vmatpush1.bf16.msra.mxu0 %v837_v29  ;;  %752 = vmatpush1.bf16.msra.mxu1 %v837_v29 }
  0x44   : > { %464 = vmatprep.subr.bf16.mxu0 %v838_v30  ;;  %737 = vmatprep.subr.bf16.mxu1 %v838_v30 }
  0x47   : > { %465 = vmatpush1.bf16.msra.mxu0 %v840_v31  ;;  %753 = vmatpush1.bf16.msra.mxu1 %v840_v31 }
  0x48   : > { %466 = vmatprep.subr.bf16.mxu0 %v841_v32  ;;  %738 = vmatprep.subr.bf16.mxu1 %v841_v32 }
  0x4b   : > { %467 = vmatpush1.bf16.msra.mxu0 %v843_v33  ;;  %754 = vmatpush1.bf16.msra.mxu1 %v843_v33 }
  0x4e   : > { %469 = vmatmul.mubr.bf16.vlgmr.msra.gmra.mrb[0].mxu0 %v844_v34  ;;  %509 = vmatmul.mubr.bf16.vlgmr.msra.gmra.mrb[0].mxu1 %v847_v35 }
  0x4f   : > { %478 = vmatprep.mubr.bf16.mxu0 %v850_v36  ;;  %518 = vmatprep.mubr.bf16.mxu1 %v852_v37 }
  0x56   : > { %479 = vmatmul.mubr.bf16.gmra.mrb[4].mxu0 %v854_v38  ;;  %519 = vmatmul.mubr.bf16.gmra.mrb[4].mxu1 %v855_v39 }
  0x57   : > { %488 = vmatprep.mubr.bf16.mxu0 %v856_v40  ;;  %528 = vmatprep.mubr.bf16.mxu1 %v858_v41 }
  0x5e   : > { %489 = vmatmul.mubr.bf16.gmra.mrb[8].mxu0 %v860_v42  ;;  %529 = vmatmul.mubr.bf16.gmra.mrb[8].mxu1 %v861_v43 }
  0x5f   : > { %498 = vmatprep.mubr.bf16.mxu0 %v862_v44  ;;  %538 = vmatprep.mubr.bf16.mxu1 %v864_v45 }
  0x66   : > { %499 = vmatmul.mubr.bf16.gmra.mrb[12].mxu0 %v866_v46  ;;  %539 = vmatmul.mubr.bf16.gmra.mrb[12].mxu1 %v867_v47 }
 0x121   : > { %v470_v48 = vpop.f32.mrb[0].mxu0  ;;  %v510_v49 = vpop.f32.mrb[0].mxu1 }
 0x122   : > { %549 = vst [vmem:[%s1119_s14] sm:$0xff] %v470_v48  ;;  %565 = vst [vmem:[%s1119_s14 + $0x80] sm:$0xff] %v510_v49  ;;  %v472_v50 = vpop.f32.mrb[1].mxu0  ;;  %v512_v51 = vpop.f32.mrb[1].mxu1 }
 0x123   : > { %550 = vst [vmem:[%s1119_s14 + $0x8] sm:$0xff] %v472_v50  ;;  %566 = vst [vmem:[%s1119_s14 + $0x88] sm:$0xff] %v512_v51  ;;  %v474_v52 = vpop.f32.mrb[2].mxu0  ;;  %v514_v53 = vpop.f32.mrb[2].mxu1 }
 0x124   : > { %551 = vst [vmem:[%s1119_s14 + $0x10] sm:$0xff] %v474_v52  ;;  %567 = vst [vmem:[%s1119_s14 + $0x90] sm:$0xff] %v514_v53  ;;  %v476_v54 = vpop.f32.mrb[3].mxu0  ;;  %v516_v55 = vpop.f32.mrb[3].mxu1 }
 0x125   : > { %552 = vst [vmem:[%s1119_s14 + $0x18] sm:$0xff] %v476_v54  ;;  %568 = vst [vmem:[%s1119_s14 + $0x98] sm:$0xff] %v516_v55 }
 0x129   : > { %v480_v56 = vpop.f32.mrb[4].mxu0  ;;  %v520_v57 = vpop.f32.mrb[4].mxu1 }
 0x12a   : > { %553 = vst [vmem:[%s1119_s14 + $0x20] sm:$0xff] %v480_v56  ;;  %569 = vst [vmem:[%s1119_s14 + $0xa0] sm:$0xff] %v520_v57  ;;  %v482_v58 = vpop.f32.mrb[5].mxu0  ;;  %v522_v59 = vpop.f32.mrb[5].mxu1 }
 0x12b   : > { %554 = vst [vmem:[%s1119_s14 + $0x28] sm:$0xff] %v482_v58  ;;  %570 = vst [vmem:[%s1119_s14 + $0xa8] sm:$0xff] %v522_v59  ;;  %v484_v60 = vpop.f32.mrb[6].mxu0  ;;  %v524_v61 = vpop.f32.mrb[6].mxu1 }
 0x12c   : > { %555 = vst [vmem:[%s1119_s14 + $0x30] sm:$0xff] %v484_v60  ;;  %571 = vst [vmem:[%s1119_s14 + $0xb0] sm:$0xff] %v524_v61  ;;  %v486_v62 = vpop.f32.mrb[7].mxu0  ;;  %v526_v63 = vpop.f32.mrb[7].mxu1 }
 0x12d   : > { %556 = vst [vmem:[%s1119_s14 + $0x38] sm:$0xff] %v486_v62  ;;  %572 = vst [vmem:[%s1119_s14 + $0xb8] sm:$0xff] %v526_v63 }
 0x131   : > { %v490_v0 = vpop.f32.mrb[8].mxu0  ;;  %v530_v1 = vpop.f32.mrb[8].mxu1 }
 0x132   : > { %557 = vst [vmem:[%s1119_s14 + $0x40] sm:$0xff] %v490_v0  ;;  %573 = vst [vmem:[%s1119_s14 + $0xc0] sm:$0xff] %v530_v1  ;;  %v492_v2 = vpop.f32.mrb[9].mxu0  ;;  %v532_v3 = vpop.f32.mrb[9].mxu1 }
 0x133   : > { %558 = vst [vmem:[%s1119_s14 + $0x48] sm:$0xff] %v492_v2  ;;  %574 = vst [vmem:[%s1119_s14 + $0xc8] sm:$0xff] %v532_v3  ;;  %v494_v4 = vpop.f32.mrb[10].mxu0  ;;  %v534_v5 = vpop.f32.mrb[10].mxu1 }
 0x134   : > { %559 = vst [vmem:[%s1119_s14 + $0x50] sm:$0xff] %v494_v4  ;;  %575 = vst [vmem:[%s1119_s14 + $0xd0] sm:$0xff] %v534_v5  ;;  %v496_v6 = vpop.f32.mrb[11].mxu0  ;;  %v536_v7 = vpop.f32.mrb[11].mxu1 }
 0x135   : > { %560 = vst [vmem:[%s1119_s14 + $0x58] sm:$0xff] %v496_v6  ;;  %576 = vst [vmem:[%s1119_s14 + $0xd8] sm:$0xff] %v536_v7 }
 0x139   : > { %v500_v8 = vpop.f32.mrb[12].mxu0  ;;  %v540_v9 = vpop.f32.mrb[12].mxu1 }
 0x13a   : > { %561 = vst [vmem:[%s1119_s14 + $0x60] sm:$0xff] %v500_v8  ;;  %577 = vst [vmem:[%s1119_s14 + $0xe0] sm:$0xff] %v540_v9  ;;  %v502_v10 = vpop.f32.mrb[13].mxu0  ;;  %v542_v11 = vpop.f32.mrb[13].mxu1 }
 0x13b   : > { %562 = vst [vmem:[%s1119_s14 + $0x68] sm:$0xff] %v502_v10  ;;  %578 = vst [vmem:[%s1119_s14 + $0xe8] sm:$0xff] %v542_v11  ;;  %v504_v12 = vpop.f32.mrb[14].mxu0  ;;  %v544_v13 = vpop.f32.mrb[14].mxu1 }
 0x13c   : > { %563 = vst [vmem:[%s1119_s14 + $0x70] sm:$0xff] %v504_v12  ;;  %579 = vst [vmem:[%s1119_s14 + $0xf0] sm:$0xff] %v544_v13  ;;  %v506_v14 = vpop.f32.mrb[15].mxu0  ;;  %v546_v15 = vpop.f32.mrb[15].mxu1 }
 0x13d   : > { %564 = vst [vmem:[%s1119_s14 + $0x78] sm:$0xff] %v506_v14  ;;  %580 = vst [vmem:[%s1119_s14 + $0xf8] sm:$0xff] %v546_v15 }
 0x13e   : > { %881 = shalt.err (!%p878_p3)
}
 0x13f   : > { %s882_s27 = scalar_lea.hbm %s1152_s22, 4096  ;;  %s886_s4 = scalar_lea.hbm %s1207_s2, 8192 }
 0x140   : > { %p883_p4 = scmp.ne.s32.totalorder %s1152_s22, %s882_s27  ;;  %p887_p9 = scmp.lt.u32.totalorder %s1152_s22, %s1207_s2 }
 0x141   : > { %p888_p10 = scmp.lt.u32.totalorder %s886_s4, %s882_s27  ;;  %p890_p12 = scmp.lt.u32.totalorder %s882_s27, %s1152_s22 }
 0x142   : > { %p884_p7 = pnand %p883_p4, %p988_p5 }
 0x143   : > { %p889_p11 = por %p888_p10, %p887_p9 }
 0x144   : > { %p885_p8 = pneg %p884_p7 }
 0x145   : > { %p891_p13 = por %p890_p12, %p889_p11 }
 0x147   : > { %p892_p0 = pnand %p891_p13, %p885_p8 }
 0x149   : > { %895 = shalt.err (!%p892_p0)
}
 0x14a   : > { %s933_s6 = smov 256   ;;  %s934_s7 = smov 16  }
 0x14b   : > { %755 = dma.vmem_to_hbm [thread:$0]  (%p988_p5), %s1154_s16, 4096, %s1152_s22, %s1164_s13, %s933_s6, %s933_s6, %s934_s7  }
 0x14c PF: > { %p761_p1 = scmp.ge.s32.totalorder %s930_s12, 2  ;;  %s611_s8 = sand.u32 1, %s918_s9  }
 0x14d   : > { %s612_s14 = scalar_lea.sflag [#allocation3], %s611_s8 }
 0x14e   : > { %p758_p2 = pnand %p761_p1, %p992_p6 }
 0x150   : > { %913 = dma.done.wait (!%p758_p2), %s612_s14, 4096  }
 0x151   : > { %915 = vsyncadd (!%p758_p2), %s612_s14, 4294963200  ;;  %p12_p3 = scmp.ge.s32.totalorder %s975_s15, 4   ;;  %s1210_s9 = smov %s922_s10 }
 0x152   : > { %s1211_s10 = smov %s926_s11  ;;  %s1212_s11 = smov %s986_s18 }
 0x153   : > { %s1213_s12 = smov %s975_s15  ;;  %14 = sbr.rel (!%p12_p3) target bundleno = 3 (0x3), region = 63 }
 0x15a   :  { %617 = vsyncpa [#allocation3], 1 }
 0x15b   :  { %619 = vsyncpa [#allocation3 + $0x1], 1 }

</bundles_post_ra>
